<compile_context>
chip_gen: v6e
topology: v6e:2x2x1
jax: 0.10.0
libtpu: 0.0.40
codegen_flags: <defaults>
</compile_context>

<pallas_src>
import jax
import jax.numpy as jnp
import numpy as np
from jax import lax
from jax.experimental import pallas as pl
from jax.experimental.pallas import tpu as pltpu


def _round_up(x, m):
    return ((x + m - 1) // m) * m


# ----------------------------------------------------------------------------
# Pallas kernel: single grid step; full LSTM recurrence + output head inside.
# ----------------------------------------------------------------------------
def _cond_lstm_kernel(x_ref, wih_ref, whh_ref, b_ref, wout_ref, bout_ref,
                      ctrl_ref, hn_ref, cn_ref,
                      xp_scr, hs_scr):
    TBp, G = xp_scr.shape                 # T*Bp rows, 4*Hp gate columns
    Hp = whh_ref.shape[0]                 # padded hidden size (multiple of 128)
    Bp = hn_ref.shape[0]                  # padded batch (multiple of 8)
    T = TBp // Bp
    unroll = True if T <= 32 else 8       # full unroll short loops, partial otherwise

    # ---- 1) input projection for ALL timesteps: ONE flattened matmul --------
    #      xp = x2d @ W_ih^T + (b_ih + b_hh)            -> (T*Bp, 4*Hp)
    xp_scr[...] = (jnp.dot(x_ref[...], wih_ref[...],
                           preferred_element_type=jnp.float32)
                   + b_ref[...])

    # ---- 2) sequential recurrence: exactly ONE matmul per step ---------------
    # gate packing is [i, f, o, g]: sigmoids contiguous -> one sigmoid call.
    def step(t, carry):
        h, c = carry
        off = pl.multiple_of(t * Bp, Bp)           # sublane-aligned time slice
        gates = xp_scr[pl.ds(off, Bp), :] + jnp.dot(
            h, whh_ref[...], preferred_element_type=jnp.float32)
        sg = jax.nn.sigmoid(gates[:, 0:3 * Hp])    # i | f | o  (3-vreg slab)
        i_g = sg[:, 0 * Hp:1 * Hp]
        f_g = sg[:, 1 * Hp:2 * Hp]
        o_g = sg[:, 2 * Hp:3 * Hp]
        g_g = jnp.tanh(gates[:, 3 * Hp:4 * Hp])
        c_new = f_g * c + i_g * g_g
        h_new = o_g * jnp.tanh(c_new)
        hs_scr[pl.ds(off, Bp), :] = h_new
        return (h_new, c_new)

    h0 = jnp.zeros((Bp, Hp), jnp.float32)          # hx=None -> zero initial state
    c0 = jnp.zeros((Bp, Hp), jnp.float32)
    h_last, c_last = lax.fori_loop(0, T, step, (h0, c0), unroll=unroll)

    # final hidden / cell state: written exactly once
    hn_ref[...] = h_last.astype(hn_ref.dtype)
    cn_ref[...] = c_last.astype(cn_ref.dtype)

    # ---- 3) output head: ONE flattened matmul, dense (T*Bp, Op) store --------
    y = (jnp.dot(hs_scr[...], wout_ref[...],
                 preferred_element_type=jnp.float32)
         + bout_ref[...])
    col = lax.broadcasted_iota(jnp.int32, y.shape, 1)
    # col 0 -> tanh (steer); other cols -> sigmoid (throttle, brake, pad)
    ctrl_ref[...] = jnp.where(col == 0, jnp.tanh(y),
                              jax.nn.sigmoid(y)).astype(ctrl_ref.dtype)


# ----------------------------------------------------------------------------
# Wrapper: concat, layout transposes, gate-aligned zero padding, pallas_call.
# ----------------------------------------------------------------------------
@jax.jit
def cond_lstm_forward(features, commands, params):
    w_ih, w_hh, b_ih, b_hh, w_out, b_out = (
        params["w_ih"], params["w_hh"], params["b_ih"],
        params["b_hh"], params["w_out"], params["b_out"])

    x = jnp.concatenate([features, commands], axis=-1)        # (B, T, D)
    B, T, D = x.shape
    H = w_hh.shape[1]
    O = w_out.shape[0]

    Hp = _round_up(H, 128)   # lane-aligned gates / hidden lanes
    Op = _round_up(O, 128)   # lane-dense controls output block
    Bp = _round_up(B, 8)     # sublane-aligned per-timestep batch slices
    G = 4 * Hp
    TBp = T * Bp
    f32 = jnp.float32

    # time-major, batch padded to Bp, flattened to 2-D (T*Bp, D)
    x_tm = jnp.transpose(x, (1, 0, 2)).astype(f32)            # (T, B, D)
    x2d = jnp.zeros((T, Bp, D), f32).at[:, :B, :].set(x_tm).reshape(TBp, D)

    # Repack gates from PyTorch order [i, f, g, o] to [i, f, o, g] so the three
    # sigmoid gates are contiguous.  Gate k occupies columns [k*Hp, k*Hp + H);
    # padded columns/rows are zero so padded hidden lanes stay at h = c = 0.
    gate_perm = jnp.array([0, 1, 3, 2])
    wih_p = jnp.zeros((D, 4, Hp), f32).at[:, :, :H].set(
        jnp.transpose(w_ih).astype(f32).reshape(D, 4, H)[:, gate_perm, :]
    ).reshape(D, G)
    whh_p = jnp.zeros((Hp, 4, Hp), f32).at[:H, :, :H].set(
        jnp.transpose(w_hh).astype(f32).reshape(H, 4, H)[:, gate_perm, :]
    ).reshape(Hp, G)
    b_p = jnp.zeros((4, Hp), f32).at[:, :H].set(
        (b_ih + b_hh).astype(f32).reshape(4, H)[gate_perm, :]).reshape(1, G)
    wout_p = jnp.zeros((Hp, Op), f32).at[:H, :O].set(
        jnp.transpose(w_out).astype(f32))
    bout_p = jnp.zeros((1, Op), f32).at[:, :O].set(b_out.astype(f32)[None, :])

    # Explicit VMEM budget (everything resident under grid=(1,)); capped at
    # 64 MiB so the same request is valid on v5e/v6e/v7x.
    Dp = _round_up(D, 128)
    vmem_need = 4 * (TBp * Dp + D * G + Hp * G + G + Hp * Op + Op   # inputs
                     + TBp * Op + 2 * Bp * Hp                        # outputs
                     + TBp * G + TBp * Hp)                           # scratch
    vmem_limit = int(min(64 * 1024 * 1024,
                         max(16 * 1024 * 1024, 2 * vmem_need)))
    # TODO(synk): for very large T, chunk the time axis (projection/head phases)
    # instead of keeping xp_scr/hs_scr fully resident.

    ctrl_p, hn_p, cn_p = pl.pallas_call(
        _cond_lstm_kernel,
        out_shape=(
            jax.ShapeDtypeStruct((TBp, Op), f32),
            jax.ShapeDtypeStruct((Bp, Hp), f32),
            jax.ShapeDtypeStruct((Bp, Hp), f32),
        ),
        grid_spec=pltpu.PrefetchScalarGridSpec(
            num_scalar_prefetch=0,
            grid=(1,),                                        # everything resident in VMEM
            in_specs=[
                pl.BlockSpec((TBp, D), lambda i: (0, 0)),     # x (time-major, flattened)
                pl.BlockSpec((D, G), lambda i: (0, 0)),       # W_ih^T  (gate-packed)
                pl.BlockSpec((Hp, G), lambda i: (0, 0)),      # W_hh^T  (gate-packed)
                pl.BlockSpec((1, G), lambda i: (0, 0)),       # b_ih + b_hh
                pl.BlockSpec((Hp, Op), lambda i: (0, 0)),     # W_out^T
                pl.BlockSpec((1, Op), lambda i: (0, 0)),      # b_out
            ],
            out_specs=[
                pl.BlockSpec((TBp, Op), lambda i: (0, 0)),    # controls (flattened, padded)
                pl.BlockSpec((Bp, Hp), lambda i: (0, 0)),     # h_n (padded)
                pl.BlockSpec((Bp, Hp), lambda i: (0, 0)),     # c_n (padded)
            ],
            scratch_shapes=[
                pltpu.VMEM((TBp, G), f32),    # xp: precomputed input projections
                pltpu.VMEM((TBp, Hp), f32),   # hs: per-step hidden states
            ],
        ),
        compiler_params=pltpu.CompilerParams(
            dimension_semantics=("arbitrary",),
            vmem_limit_bytes=vmem_limit,
        ),
    )(x2d, wih_p, whh_p, b_p, wout_p, bout_p)

    ctrl = ctrl_p.reshape(T, Bp, Op)[:, :B, :O]               # unpad
    controls = jnp.transpose(ctrl, (1, 0, 2))                 # (B, T, O) batch-first
    h_n = hn_p[:B, :H][None, :, :]                            # (1, B, H) like nn.LSTM
    c_n = cn_p[:B, :H][None, :, :]
    # TODO(synk): optional hx (user-supplied initial state) is not wired through;
    # the module's default hx=None (zero init) semantics are implemented.
    return controls, (h_n, c_n)


# ----------------------------------------------------------------------------
# Pure-JAX reference (correctness check only).
# ----------------------------------------------------------------------------
def cond_lstm_reference(features, commands, params):
    w_ih, w_hh, b_ih, b_hh, w_out, b_out = (
        params["w_ih"], params["w_hh"], params["b_ih"],
        params["b_hh"], params["w_out"], params["b_out"])
    x = jnp.concatenate([features, commands], axis=-1)   # (B, T, D)
    B, T, D = x.shape
    H = w_hh.shape[1]

    def step(carry, x_t):
        h, c = carry
        gates = x_t @ w_ih.T + h @ w_hh.T + b_ih + b_hh
        i = jax.nn.sigmoid(gates[:, 0 * H:1 * H])
        f = jax.nn.sigmoid(gates[:, 1 * H:2 * H])
        g = jnp.tanh(gates[:, 2 * H:3 * H])
        o = jax.nn.sigmoid(gates[:, 3 * H:4 * H])
        c = f * c + i * g
        h = o * jnp.tanh(c)
        return (h, c), h

    h0 = jnp.zeros((B, H), jnp.float32)
    c0 = jnp.zeros((B, H), jnp.float32)
    (h_n, c_n), hs = lax.scan(step, (h0, c0), jnp.transpose(x, (1, 0, 2)))
    hs = jnp.transpose(hs, (1, 0, 2))                     # (B, T, H)
    y = hs @ w_out.T + b_out                              # (B, T, 3)
    controls = jnp.stack(
        [jnp.tanh(y[:, :, 0]), jax.nn.sigmoid(y[:, :, 1]), jax.nn.sigmoid(y[:, :, 2])],
        axis=2)
    return controls, (h_n[None], c_n[None])


# ----------------------------------------------------------------------------
# Deterministic parameter init (PyTorch-style uniform(-1/sqrt(H), 1/sqrt(H))).
# ----------------------------------------------------------------------------
def init_params(key, n_features, n_commands, n_neurons, n_outputs):
    D = n_features + n_commands
    H = n_neurons
    stdv = 1.0 / np.sqrt(H)
    ks = jax.random.split(key, 6)
    u = lambda k, shape: jax.random.uniform(k, shape, jnp.float32, -stdv, stdv)
    return {
        "w_ih": u(ks[0], (4 * H, D)),
        "w_hh": u(ks[1], (4 * H, H)),
        "b_ih": u(ks[2], (4 * H,)),
        "b_hh": u(ks[3], (4 * H,)),
        "w_out": u(ks[4], (n_outputs, H)),
        "b_out": u(ks[5], (n_outputs,)),
    }


if __name__ == "__main__":
    n_features, n_commands, n_neurons, n_outputs = 4, 4, 32, 3
    B, T = 2, 8

    key = jax.random.PRNGKey(0)
    kp, kf, kc = jax.random.split(key, 3)
    params = init_params(kp, n_features, n_commands, n_neurons, n_outputs)
    features = jax.random.normal(kf, (B, T, n_features), jnp.float32)
    commands = jax.random.normal(kc, (B, T, n_commands), jnp.float32)

    controls, (h_n, c_n) = cond_lstm_forward(features, commands, params)
    controls = jax.block_until_ready(controls)
    h_n = jax.block_until_ready(h_n)
    c_n = jax.block_until_ready(c_n)

    ref_controls, (ref_h, ref_c) = cond_lstm_reference(features, commands, params)
    np.testing.assert_allclose(np.asarray(controls), np.asarray(ref_controls),
                               atol=1e-4, rtol=1e-4)
    np.testing.assert_allclose(np.asarray(h_n), np.asarray(ref_h), atol=1e-4, rtol=1e-4)
    np.testing.assert_allclose(np.asarray(c_n), np.asarray(ref_c), atol=1e-4, rtol=1e-4)

    assert controls.shape == (B, T, n_outputs)
    assert h_n.shape == (1, B, n_neurons) and c_n.shape == (1, B, n_neurons)
    print("KERNEL_OK")
</pallas_src>

<mosaic_0001>
module attributes {stable_mosaic.version = 11 : i64} {
  func.func @_cond_lstm_kernel(%arg0: i32, %arg1: memref<64x8xf32, #tpu.memory_space<vmem>>, %arg2: memref<8x512xf32, #tpu.memory_space<vmem>>, %arg3: memref<128x512xf32, #tpu.memory_space<vmem>>, %arg4: memref<1x512xf32, #tpu.memory_space<vmem>>, %arg5: memref<128x128xf32, #tpu.memory_space<vmem>>, %arg6: memref<1x128xf32, #tpu.memory_space<vmem>>, %arg7: memref<64x128xf32, #tpu.memory_space<vmem>>, %arg8: memref<8x128xf32, #tpu.memory_space<vmem>>, %arg9: memref<8x128xf32, #tpu.memory_space<vmem>>, %arg10: memref<64x512xf32, #tpu.memory_space<vmem>>, %arg11: memref<64x128xf32, #tpu.memory_space<vmem>>) attributes {dimension_semantics = [#tpu.dimension_semantics<arbitrary>], iteration_bounds = array<i64: 1>, scalar_prefetch = 0 : i64, scratch_operands = 2 : i64, tpu.core_type = #tpu.core_type<tc>, window_params = [{pipeline_mode = #tpu.pipeline_mode<synchronous>, transform_indices = @transform_0, window_bounds = array<i64: 64, 8>}, {pipeline_mode = #tpu.pipeline_mode<synchronous>, transform_indices = @transform_1, window_bounds = array<i64: 8, 512>}, {pipeline_mode = #tpu.pipeline_mode<synchronous>, transform_indices = @transform_2, window_bounds = array<i64: 128, 512>}, {pipeline_mode = #tpu.pipeline_mode<synchronous>, transform_indices = @transform_3, window_bounds = array<i64: 1, 512>}, {pipeline_mode = #tpu.pipeline_mode<synchronous>, transform_indices = @transform_4, window_bounds = array<i64: 128, 128>}, {pipeline_mode = #tpu.pipeline_mode<synchronous>, transform_indices = @transform_5, window_bounds = array<i64: 1, 128>}, {pipeline_mode = #tpu.pipeline_mode<synchronous>, transform_indices = @transform_6, window_bounds = array<i64: 64, 128>}, {pipeline_mode = #tpu.pipeline_mode<synchronous>, transform_indices = @transform_7, window_bounds = array<i64: 8, 128>}, {pipeline_mode = #tpu.pipeline_mode<synchronous>, transform_indices = @transform_8, window_bounds = array<i64: 8, 128>}]} {
    %c0 = arith.constant 0 : index
    %c0_0 = arith.constant 0 : index
    %0 = vector.load %arg1[%c0, %c0_0] : memref<64x8xf32, #tpu.memory_space<vmem>>, vector<64x8xf32>
    %c0_1 = arith.constant 0 : index
    %c0_2 = arith.constant 0 : index
    %1 = vector.load %arg2[%c0_1, %c0_2] : memref<8x512xf32, #tpu.memory_space<vmem>>, vector<8x512xf32>
    %cst = arith.constant dense<0.000000e+00> : vector<64x512xf32>
    %2 = tpu.matmul %0, %1, %cst {dimension_numbers = #tpu.dot_dimension_numbers<[1], [0], [0], [1], [0, 0, 1, 1], [], []>} : vector<64x8xf32>, vector<8x512xf32>, vector<64x512xf32> -> vector<64x512xf32>
    %c0_3 = arith.constant 0 : index
    %c0_4 = arith.constant 0 : index
    %3 = vector.load %arg4[%c0_3, %c0_4] : memref<1x512xf32, #tpu.memory_space<vmem>>, vector<1x512xf32>
    %4 = vector.broadcast %3 : vector<1x512xf32> to vector<64x512xf32>
    %5 = arith.addf %2, %4 : vector<64x512xf32>
    %c0_5 = arith.constant 0 : index
    %c0_6 = arith.constant 0 : index
    %6 = vector.load %arg10[%c0_5, %c0_6] : memref<64x512xf32, #tpu.memory_space<vmem>>, vector<64x512xf32>
    tpu.vector_store %arg10[%c0_5, %c0_6], %5 {strides = array<i32>} : memref<64x512xf32, #tpu.memory_space<vmem>>, vector<64x512xf32>,
    %cst_7 = arith.constant 0.000000e+00 : f32
    %7 = vector.broadcast %cst_7 : f32 to vector<8x128xf32>
    %cst_8 = arith.constant 0.000000e+00 : f32
    %8 = vector.broadcast %cst_8 : f32 to vector<8x128xf32>
    %c0_i32 = arith.constant 0 : i32
    %c8_i32 = arith.constant 8 : i32
    %9 = arith.muli %c0_i32, %c8_i32 : i32
    %10 = tpu.assume_multiple %9, 8 : i32
    %11 = arith.index_cast %10 : i32 to index
    %c0_9 = arith.constant 0 : index
    %12 = vector.load %arg10[%11, %c0_9] : memref<64x512xf32, #tpu.memory_space<vmem>>, vector<8x512xf32>
    %c0_10 = arith.constant 0 : index
    %c0_11 = arith.constant 0 : index
    %13 = vector.load %arg3[%c0_10, %c0_11] : memref<128x512xf32, #tpu.memory_space<vmem>>, vector<128x512xf32>
    %cst_12 = arith.constant dense<0.000000e+00> : vector<8x512xf32>
    %14 = tpu.matmul %7, %13, %cst_12 {dimension_numbers = #tpu.dot_dimension_numbers<[1], [0], [0], [1], [0, 0, 1, 1], [], []>} : vector<8x128xf32>, vector<128x512xf32>, vector<8x512xf32> -> vector<8x512xf32>
    %15 = arith.addf %12, %14 : vector<8x512xf32>
    %16 = vector.extract_strided_slice %15 {offsets = [0, 0], sizes = [8, 384], strides = [1, 1]} : vector<8x512xf32> to vector<8x384xf32>
    %17 = arith.negf %16 : vector<8x384xf32>
    %18 = math.exp %17 : vector<8x384xf32>
    %cst_13 = arith.constant 1.000000e+00 : f32
    %19 = vector.broadcast %cst_13 : f32 to vector<8x384xf32>
    %20 = arith.addf %19, %18 : vector<8x384xf32>
    %21 = arith.divf %19, %20 : vector<8x384xf32>
    %22 = vector.extract_strided_slice %21 {offsets = [0, 0], sizes = [8, 128], strides = [1, 1]} : vector<8x384xf32> to vector<8x128xf32>
    %23 = vector.extract_strided_slice %21 {offsets = [0, 128], sizes = [8, 128], strides = [1, 1]} : vector<8x384xf32> to vector<8x128xf32>
    %24 = vector.extract_strided_slice %21 {offsets = [0, 256], sizes = [8, 128], strides = [1, 1]} : vector<8x384xf32> to vector<8x128xf32>
    %25 = vector.extract_strided_slice %15 {offsets = [0, 384], sizes = [8, 128], strides = [1, 1]} : vector<8x512xf32> to vector<8x128xf32>
    %26 = math.tanh %25 : vector<8x128xf32>
    %27 = arith.mulf %23, %8 : vector<8x128xf32>
    %28 = arith.mulf %22, %26 : vector<8x128xf32>
    %29 = arith.addf %27, %28 : vector<8x128xf32>
    %30 = math.tanh %29 : vector<8x128xf32>
    %31 = arith.mulf %24, %30 : vector<8x128xf32>
    %32 = arith.index_cast %10 : i32 to index
    %c0_14 = arith.constant 0 : index
    %33 = vector.load %arg11[%32, %c0_14] : memref<64x128xf32, #tpu.memory_space<vmem>>, vector<8x128xf32>
    tpu.vector_store %arg11[%32, %c0_14], %31 {strides = array<i32>} : memref<64x128xf32, #tpu.memory_space<vmem>>, vector<8x128xf32>,
    %c1_i32 = arith.constant 1 : i32
    %c8_i32_15 = arith.constant 8 : i32
    %34 = arith.muli %c1_i32, %c8_i32_15 : i32
    %35 = tpu.assume_multiple %34, 8 : i32
    %36 = arith.index_cast %35 : i32 to index
    %c0_16 = arith.constant 0 : index
    %37 = vector.load %arg10[%36, %c0_16] : memref<64x512xf32, #tpu.memory_space<vmem>>, vector<8x512xf32>
    %c0_17 = arith.constant 0 : index
    %c0_18 = arith.constant 0 : index
    %38 = vector.load %arg3[%c0_17, %c0_18] : memref<128x512xf32, #tpu.memory_space<vmem>>, vector<128x512xf32>
    %cst_19 = arith.constant dense<0.000000e+00> : vector<8x512xf32>
    %39 = tpu.matmul %31, %38, %cst_19 {dimension_numbers = #tpu.dot_dimension_numbers<[1], [0], [0], [1], [0, 0, 1, 1], [], []>} : vector<8x128xf32>, vector<128x512xf32>, vector<8x512xf32> -> vector<8x512xf32>
    %40 = arith.addf %37, %39 : vector<8x512xf32>
    %41 = vector.extract_strided_slice %40 {offsets = [0, 0], sizes = [8, 384], strides = [1, 1]} : vector<8x512xf32> to vector<8x384xf32>
    %42 = arith.negf %41 : vector<8x384xf32>
    %43 = math.exp %42 : vector<8x384xf32>
    %cst_20 = arith.constant 1.000000e+00 : f32
    %44 = vector.broadcast %cst_20 : f32 to vector<8x384xf32>
    %45 = arith.addf %44, %43 : vector<8x384xf32>
    %46 = arith.divf %44, %45 : vector<8x384xf32>
    %47 = vector.extract_strided_slice %46 {offsets = [0, 0], sizes = [8, 128], strides = [1, 1]} : vector<8x384xf32> to vector<8x128xf32>
    %48 = vector.extract_strided_slice %46 {offsets = [0, 128], sizes = [8, 128], strides = [1, 1]} : vector<8x384xf32> to vector<8x128xf32>
    %49 = vector.extract_strided_slice %46 {offsets = [0, 256], sizes = [8, 128], strides = [1, 1]} : vector<8x384xf32> to vector<8x128xf32>
    %50 = vector.extract_strided_slice %40 {offsets = [0, 384], sizes = [8, 128], strides = [1, 1]} : vector<8x512xf32> to vector<8x128xf32>
    %51 = math.tanh %50 : vector<8x128xf32>
    %52 = arith.mulf %48, %29 : vector<8x128xf32>
    %53 = arith.mulf %47, %51 : vector<8x128xf32>
    %54 = arith.addf %52, %53 : vector<8x128xf32>
    %55 = math.tanh %54 : vector<8x128xf32>
    %56 = arith.mulf %49, %55 : vector<8x128xf32>
    %57 = arith.index_cast %35 : i32 to index
    %c0_21 = arith.constant 0 : index
    %58 = vector.load %arg11[%57, %c0_21] : memref<64x128xf32, #tpu.memory_space<vmem>>, vector<8x128xf32>
    tpu.vector_store %arg11[%57, %c0_21], %56 {strides = array<i32>} : memref<64x128xf32, #tpu.memory_space<vmem>>, vector<8x128xf32>,
    %c2_i32 = arith.constant 2 : i32
    %c8_i32_22 = arith.constant 8 : i32
    %59 = arith.muli %c2_i32, %c8_i32_22 : i32
    %60 = tpu.assume_multiple %59, 8 : i32
    %61 = arith.index_cast %60 : i32 to index
    %c0_23 = arith.constant 0 : index
    %62 = vector.load %arg10[%61, %c0_23] : memref<64x512xf32, #tpu.memory_space<vmem>>, vector<8x512xf32>
    %c0_24 = arith.constant 0 : index
    %c0_25 = arith.constant 0 : index
    %63 = vector.load %arg3[%c0_24, %c0_25] : memref<128x512xf32, #tpu.memory_space<vmem>>, vector<128x512xf32>
    %cst_26 = arith.constant dense<0.000000e+00> : vector<8x512xf32>
    %64 = tpu.matmul %56, %63, %cst_26 {dimension_numbers = #tpu.dot_dimension_numbers<[1], [0], [0], [1], [0, 0, 1, 1], [], []>} : vector<8x128xf32>, vector<128x512xf32>, vector<8x512xf32> -> vector<8x512xf32>
    %65 = arith.addf %62, %64 : vector<8x512xf32>
    %66 = vector.extract_strided_slice %65 {offsets = [0, 0], sizes = [8, 384], strides = [1, 1]} : vector<8x512xf32> to vector<8x384xf32>
    %67 = arith.negf %66 : vector<8x384xf32>
    %68 = math.exp %67 : vector<8x384xf32>
    %cst_27 = arith.constant 1.000000e+00 : f32
    %69 = vector.broadcast %cst_27 : f32 to vector<8x384xf32>
    %70 = arith.addf %69, %68 : vector<8x384xf32>
    %71 = arith.divf %69, %70 : vector<8x384xf32>
    %72 = vector.extract_strided_slice %71 {offsets = [0, 0], sizes = [8, 128], strides = [1, 1]} : vector<8x384xf32> to vector<8x128xf32>
    %73 = vector.extract_strided_slice %71 {offsets = [0, 128], sizes = [8, 128], strides = [1, 1]} : vector<8x384xf32> to vector<8x128xf32>
    %74 = vector.extract_strided_slice %71 {offsets = [0, 256], sizes = [8, 128], strides = [1, 1]} : vector<8x384xf32> to vector<8x128xf32>
    %75 = vector.extract_strided_slice %65 {offsets = [0, 384], sizes = [8, 128], strides = [1, 1]} : vector<8x512xf32> to vector<8x128xf32>
    %76 = math.tanh %75 : vector<8x128xf32>
    %77 = arith.mulf %73, %54 : vector<8x128xf32>
    %78 = arith.mulf %72, %76 : vector<8x128xf32>
    %79 = arith.addf %77, %78 : vector<8x128xf32>
    %80 = math.tanh %79 : vector<8x128xf32>
    %81 = arith.mulf %74, %80 : vector<8x128xf32>
    %82 = arith.index_cast %60 : i32 to index
    %c0_28 = arith.constant 0 : index
    %83 = vector.load %arg11[%82, %c0_28] : memref<64x128xf32, #tpu.memory_space<vmem>>, vector<8x128xf32>
    tpu.vector_store %arg11[%82, %c0_28], %81 {strides = array<i32>} : memref<64x128xf32, #tpu.memory_space<vmem>>, vector<8x128xf32>,
    %c3_i32 = arith.constant 3 : i32
    %c8_i32_29 = arith.constant 8 : i32
    %84 = arith.muli %c3_i32, %c8_i32_29 : i32
    %85 = tpu.assume_multiple %84, 8 : i32
    %86 = arith.index_cast %85 : i32 to index
    %c0_30 = arith.constant 0 : index
    %87 = vector.load %arg10[%86, %c0_30] : memref<64x512xf32, #tpu.memory_space<vmem>>, vector<8x512xf32>
    %c0_31 = arith.constant 0 : index
    %c0_32 = arith.constant 0 : index
    %88 = vector.load %arg3[%c0_31, %c0_32] : memref<128x512xf32, #tpu.memory_space<vmem>>, vector<128x512xf32>
    %cst_33 = arith.constant dense<0.000000e+00> : vector<8x512xf32>
    %89 = tpu.matmul %81, %88, %cst_33 {dimension_numbers = #tpu.dot_dimension_numbers<[1], [0], [0], [1], [0, 0, 1, 1], [], []>} : vector<8x128xf32>, vector<128x512xf32>, vector<8x512xf32> -> vector<8x512xf32>
    %90 = arith.addf %87, %89 : vector<8x512xf32>
    %91 = vector.extract_strided_slice %90 {offsets = [0, 0], sizes = [8, 384], strides = [1, 1]} : vector<8x512xf32> to vector<8x384xf32>
    %92 = arith.negf %91 : vector<8x384xf32>
    %93 = math.exp %92 : vector<8x384xf32>
    %cst_34 = arith.constant 1.000000e+00 : f32
    %94 = vector.broadcast %cst_34 : f32 to vector<8x384xf32>
    %95 = arith.addf %94, %93 : vector<8x384xf32>
    %96 = arith.divf %94, %95 : vector<8x384xf32>
    %97 = vector.extract_strided_slice %96 {offsets = [0, 0], sizes = [8, 128], strides = [1, 1]} : vector<8x384xf32> to vector<8x128xf32>
    %98 = vector.extract_strided_slice %96 {offsets = [0, 128], sizes = [8, 128], strides = [1, 1]} : vector<8x384xf32> to vector<8x128xf32>
    %99 = vector.extract_strided_slice %96 {offsets = [0, 256], sizes = [8, 128], strides = [1, 1]} : vector<8x384xf32> to vector<8x128xf32>
    %100 = vector.extract_strided_slice %90 {offsets = [0, 384], sizes = [8, 128], strides = [1, 1]} : vector<8x512xf32> to vector<8x128xf32>
    %101 = math.tanh %100 : vector<8x128xf32>
    %102 = arith.mulf %98, %79 : vector<8x128xf32>
    %103 = arith.mulf %97, %101 : vector<8x128xf32>
    %104 = arith.addf %102, %103 : vector<8x128xf32>
    %105 = math.tanh %104 : vector<8x128xf32>
    %106 = arith.mulf %99, %105 : vector<8x128xf32>
    %107 = arith.index_cast %85 : i32 to index
    %c0_35 = arith.constant 0 : index
    %108 = vector.load %arg11[%107, %c0_35] : memref<64x128xf32, #tpu.memory_space<vmem>>, vector<8x128xf32>
    tpu.vector_store %arg11[%107, %c0_35], %106 {strides = array<i32>} : memref<64x128xf32, #tpu.memory_space<vmem>>, vector<8x128xf32>,
    %c4_i32 = arith.constant 4 : i32
    %c8_i32_36 = arith.constant 8 : i32
    %109 = arith.muli %c4_i32, %c8_i32_36 : i32
    %110 = tpu.assume_multiple %109, 8 : i32
    %111 = arith.index_cast %110 : i32 to index
    %c0_37 = arith.constant 0 : index
    %112 = vector.load %arg10[%111, %c0_37] : memref<64x512xf32, #tpu.memory_space<vmem>>, vector<8x512xf32>
    %c0_38 = arith.constant 0 : index
    %c0_39 = arith.constant 0 : index
    %113 = vector.load %arg3[%c0_38, %c0_39] : memref<128x512xf32, #tpu.memory_space<vmem>>, vector<128x512xf32>
    %cst_40 = arith.constant dense<0.000000e+00> : vector<8x512xf32>
    %114 = tpu.matmul %106, %113, %cst_40 {dimension_numbers = #tpu.dot_dimension_numbers<[1], [0], [0], [1], [0, 0, 1, 1], [], []>} : vector<8x128xf32>, vector<128x512xf32>, vector<8x512xf32> -> vector<8x512xf32>
    %115 = arith.addf %112, %114 : vector<8x512xf32>
    %116 = vector.extract_strided_slice %115 {offsets = [0, 0], sizes = [8, 384], strides = [1, 1]} : vector<8x512xf32> to vector<8x384xf32>
    %117 = arith.negf %116 : vector<8x384xf32>
    %118 = math.exp %117 : vector<8x384xf32>
    %cst_41 = arith.constant 1.000000e+00 : f32
    %119 = vector.broadcast %cst_41 : f32 to vector<8x384xf32>
    %120 = arith.addf %119, %118 : vector<8x384xf32>
    %121 = arith.divf %119, %120 : vector<8x384xf32>
    %122 = vector.extract_strided_slice %121 {offsets = [0, 0], sizes = [8, 128], strides = [1, 1]} : vector<8x384xf32> to vector<8x128xf32>
    %123 = vector.extract_strided_slice %121 {offsets = [0, 128], sizes = [8, 128], strides = [1, 1]} : vector<8x384xf32> to vector<8x128xf32>
    %124 = vector.extract_strided_slice %121 {offsets = [0, 256], sizes = [8, 128], strides = [1, 1]} : vector<8x384xf32> to vector<8x128xf32>
    %125 = vector.extract_strided_slice %115 {offsets = [0, 384], sizes = [8, 128], strides = [1, 1]} : vector<8x512xf32> to vector<8x128xf32>
    %126 = math.tanh %125 : vector<8x128xf32>
    %127 = arith.mulf %123, %104 : vector<8x128xf32>
    %128 = arith.mulf %122, %126 : vector<8x128xf32>
    %129 = arith.addf %127, %128 : vector<8x128xf32>
    %130 = math.tanh %129 : vector<8x128xf32>
    %131 = arith.mulf %124, %130 : vector<8x128xf32>
    %132 = arith.index_cast %110 : i32 to index
    %c0_42 = arith.constant 0 : index
    %133 = vector.load %arg11[%132, %c0_42] : memref<64x128xf32, #tpu.memory_space<vmem>>, vector<8x128xf32>
    tpu.vector_store %arg11[%132, %c0_42], %131 {strides = array<i32>} : memref<64x128xf32, #tpu.memory_space<vmem>>, vector<8x128xf32>,
    %c5_i32 = arith.constant 5 : i32
    %c8_i32_43 = arith.constant 8 : i32
    %134 = arith.muli %c5_i32, %c8_i32_43 : i32
    %135 = tpu.assume_multiple %134, 8 : i32
    %136 = arith.index_cast %135 : i32 to index
    %c0_44 = arith.constant 0 : index
    %137 = vector.load %arg10[%136, %c0_44] : memref<64x512xf32, #tpu.memory_space<vmem>>, vector<8x512xf32>
    %c0_45 = arith.constant 0 : index
    %c0_46 = arith.constant 0 : index
    %138 = vector.load %arg3[%c0_45, %c0_46] : memref<128x512xf32, #tpu.memory_space<vmem>>, vector<128x512xf32>
    %cst_47 = arith.constant dense<0.000000e+00> : vector<8x512xf32>
    %139 = tpu.matmul %131, %138, %cst_47 {dimension_numbers = #tpu.dot_dimension_numbers<[1], [0], [0], [1], [0, 0, 1, 1], [], []>} : vector<8x128xf32>, vector<128x512xf32>, vector<8x512xf32> -> vector<8x512xf32>
    %140 = arith.addf %137, %139 : vector<8x512xf32>
    %141 = vector.extract_strided_slice %140 {offsets = [0, 0], sizes = [8, 384], strides = [1, 1]} : vector<8x512xf32> to vector<8x384xf32>
    %142 = arith.negf %141 : vector<8x384xf32>
    %143 = math.exp %142 : vector<8x384xf32>
    %cst_48 = arith.constant 1.000000e+00 : f32
    %144 = vector.broadcast %cst_48 : f32 to vector<8x384xf32>
    %145 = arith.addf %144, %143 : vector<8x384xf32>
    %146 = arith.divf %144, %145 : vector<8x384xf32>
    %147 = vector.extract_strided_slice %146 {offsets = [0, 0], sizes = [8, 128], strides = [1, 1]} : vector<8x384xf32> to vector<8x128xf32>
    %148 = vector.extract_strided_slice %146 {offsets = [0, 128], sizes = [8, 128], strides = [1, 1]} : vector<8x384xf32> to vector<8x128xf32>
    %149 = vector.extract_strided_slice %146 {offsets = [0, 256], sizes = [8, 128], strides = [1, 1]} : vector<8x384xf32> to vector<8x128xf32>
    %150 = vector.extract_strided_slice %140 {offsets = [0, 384], sizes = [8, 128], strides = [1, 1]} : vector<8x512xf32> to vector<8x128xf32>
    %151 = math.tanh %150 : vector<8x128xf32>
    %152 = arith.mulf %148, %129 : vector<8x128xf32>
    %153 = arith.mulf %147, %151 : vector<8x128xf32>
    %154 = arith.addf %152, %153 : vector<8x128xf32>
    %155 = math.tanh %154 : vector<8x128xf32>
    %156 = arith.mulf %149, %155 : vector<8x128xf32>
    %157 = arith.index_cast %135 : i32 to index
    %c0_49 = arith.constant 0 : index
    %158 = vector.load %arg11[%157, %c0_49] : memref<64x128xf32, #tpu.memory_space<vmem>>, vector<8x128xf32>
    tpu.vector_store %arg11[%157, %c0_49], %156 {strides = array<i32>} : memref<64x128xf32, #tpu.memory_space<vmem>>, vector<8x128xf32>,
    %c6_i32 = arith.constant 6 : i32
    %c8_i32_50 = arith.constant 8 : i32
    %159 = arith.muli %c6_i32, %c8_i32_50 : i32
    %160 = tpu.assume_multiple %159, 8 : i32
    %161 = arith.index_cast %160 : i32 to index
    %c0_51 = arith.constant 0 : index
    %162 = vector.load %arg10[%161, %c0_51] : memref<64x512xf32, #tpu.memory_space<vmem>>, vector<8x512xf32>
    %c0_52 = arith.constant 0 : index
    %c0_53 = arith.constant 0 : index
    %163 = vector.load %arg3[%c0_52, %c0_53] : memref<128x512xf32, #tpu.memory_space<vmem>>, vector<128x512xf32>
    %cst_54 = arith.constant dense<0.000000e+00> : vector<8x512xf32>
    %164 = tpu.matmul %156, %163, %cst_54 {dimension_numbers = #tpu.dot_dimension_numbers<[1], [0], [0], [1], [0, 0, 1, 1], [], []>} : vector<8x128xf32>, vector<128x512xf32>, vector<8x512xf32> -> vector<8x512xf32>
    %165 = arith.addf %162, %164 : vector<8x512xf32>
    %166 = vector.extract_strided_slice %165 {offsets = [0, 0], sizes = [8, 384], strides = [1, 1]} : vector<8x512xf32> to vector<8x384xf32>
    %167 = arith.negf %166 : vector<8x384xf32>
    %168 = math.exp %167 : vector<8x384xf32>
    %cst_55 = arith.constant 1.000000e+00 : f32
    %169 = vector.broadcast %cst_55 : f32 to vector<8x384xf32>
    %170 = arith.addf %169, %168 : vector<8x384xf32>
    %171 = arith.divf %169, %170 : vector<8x384xf32>
    %172 = vector.extract_strided_slice %171 {offsets = [0, 0], sizes = [8, 128], strides = [1, 1]} : vector<8x384xf32> to vector<8x128xf32>
    %173 = vector.extract_strided_slice %171 {offsets = [0, 128], sizes = [8, 128], strides = [1, 1]} : vector<8x384xf32> to vector<8x128xf32>
    %174 = vector.extract_strided_slice %171 {offsets = [0, 256], sizes = [8, 128], strides = [1, 1]} : vector<8x384xf32> to vector<8x128xf32>
    %175 = vector.extract_strided_slice %165 {offsets = [0, 384], sizes = [8, 128], strides = [1, 1]} : vector<8x512xf32> to vector<8x128xf32>
    %176 = math.tanh %175 : vector<8x128xf32>
    %177 = arith.mulf %173, %154 : vector<8x128xf32>
    %178 = arith.mulf %172, %176 : vector<8x128xf32>
    %179 = arith.addf %177, %178 : vector<8x128xf32>
    %180 = math.tanh %179 : vector<8x128xf32>
    %181 = arith.mulf %174, %180 : vector<8x128xf32>
    %182 = arith.index_cast %160 : i32 to index
    %c0_56 = arith.constant 0 : index
    %183 = vector.load %arg11[%182, %c0_56] : memref<64x128xf32, #tpu.memory_space<vmem>>, vector<8x128xf32>
    tpu.vector_store %arg11[%182, %c0_56], %181 {strides = array<i32>} : memref<64x128xf32, #tpu.memory_space<vmem>>, vector<8x128xf32>,
    %c7_i32 = arith.constant 7 : i32
    %c8_i32_57 = arith.constant 8 : i32
    %184 = arith.muli %c7_i32, %c8_i32_57 : i32
    %185 = tpu.assume_multiple %184, 8 : i32
    %186 = arith.index_cast %185 : i32 to index
    %c0_58 = arith.constant 0 : index
    %187 = vector.load %arg10[%186, %c0_58] : memref<64x512xf32, #tpu.memory_space<vmem>>, vector<8x512xf32>
    %c0_59 = arith.constant 0 : index
    %c0_60 = arith.constant 0 : index
    %188 = vector.load %arg3[%c0_59, %c0_60] : memref<128x512xf32, #tpu.memory_space<vmem>>, vector<128x512xf32>
    %cst_61 = arith.constant dense<0.000000e+00> : vector<8x512xf32>
    %189 = tpu.matmul %181, %188, %cst_61 {dimension_numbers = #tpu.dot_dimension_numbers<[1], [0], [0], [1], [0, 0, 1, 1], [], []>} : vector<8x128xf32>, vector<128x512xf32>, vector<8x512xf32> -> vector<8x512xf32>
    %190 = arith.addf %187, %189 : vector<8x512xf32>
    %191 = vector.extract_strided_slice %190 {offsets = [0, 0], sizes = [8, 384], strides = [1, 1]} : vector<8x512xf32> to vector<8x384xf32>
    %192 = arith.negf %191 : vector<8x384xf32>
    %193 = math.exp %192 : vector<8x384xf32>
    %cst_62 = arith.constant 1.000000e+00 : f32
    %194 = vector.broadcast %cst_62 : f32 to vector<8x384xf32>
    %195 = arith.addf %194, %193 : vector<8x384xf32>
    %196 = arith.divf %194, %195 : vector<8x384xf32>
    %197 = vector.extract_strided_slice %196 {offsets = [0, 0], sizes = [8, 128], strides = [1, 1]} : vector<8x384xf32> to vector<8x128xf32>
    %198 = vector.extract_strided_slice %196 {offsets = [0, 128], sizes = [8, 128], strides = [1, 1]} : vector<8x384xf32> to vector<8x128xf32>
    %199 = vector.extract_strided_slice %196 {offsets = [0, 256], sizes = [8, 128], strides = [1, 1]} : vector<8x384xf32> to vector<8x128xf32>
    %200 = vector.extract_strided_slice %190 {offsets = [0, 384], sizes = [8, 128], strides = [1, 1]} : vector<8x512xf32> to vector<8x128xf32>
    %201 = math.tanh %200 : vector<8x128xf32>
    %202 = arith.mulf %198, %179 : vector<8x128xf32>
    %203 = arith.mulf %197, %201 : vector<8x128xf32>
    %204 = arith.addf %202, %203 : vector<8x128xf32>
    %205 = math.tanh %204 : vector<8x128xf32>
    %206 = arith.mulf %199, %205 : vector<8x128xf32>
    %207 = arith.index_cast %185 : i32 to index
    %c0_63 = arith.constant 0 : index
    %208 = vector.load %arg11[%207, %c0_63] : memref<64x128xf32, #tpu.memory_space<vmem>>, vector<8x128xf32>
    tpu.vector_store %arg11[%207, %c0_63], %206 {strides = array<i32>} : memref<64x128xf32, #tpu.memory_space<vmem>>, vector<8x128xf32>,
    %c8_i32_64 = arith.constant 8 : i32
    %c0_65 = arith.constant 0 : index
    %c0_66 = arith.constant 0 : index
    %209 = vector.load %arg8[%c0_65, %c0_66] : memref<8x128xf32, #tpu.memory_space<vmem>>, vector<8x128xf32>
    tpu.vector_store %arg8[%c0_65, %c0_66], %206 {strides = array<i32>} : memref<8x128xf32, #tpu.memory_space<vmem>>, vector<8x128xf32>,
    %c0_67 = arith.constant 0 : index
    %c0_68 = arith.constant 0 : index
    %210 = vector.load %arg9[%c0_67, %c0_68] : memref<8x128xf32, #tpu.memory_space<vmem>>, vector<8x128xf32>
    tpu.vector_store %arg9[%c0_67, %c0_68], %204 {strides = array<i32>} : memref<8x128xf32, #tpu.memory_space<vmem>>, vector<8x128xf32>,
    %c0_69 = arith.constant 0 : index
    %c0_70 = arith.constant 0 : index
    %211 = vector.load %arg11[%c0_69, %c0_70] : memref<64x128xf32, #tpu.memory_space<vmem>>, vector<64x128xf32>
    %c0_71 = arith.constant 0 : index
    %c0_72 = arith.constant 0 : index
    %212 = vector.load %arg5[%c0_71, %c0_72] : memref<128x128xf32, #tpu.memory_space<vmem>>, vector<128x128xf32>
    %cst_73 = arith.constant dense<0.000000e+00> : vector<64x128xf32>
    %213 = tpu.matmul %211, %212, %cst_73 {dimension_numbers = #tpu.dot_dimension_numbers<[1], [0], [0], [1], [0, 0, 1, 1], [], []>} : vector<64x128xf32>, vector<128x128xf32>, vector<64x128xf32> -> vector<64x128xf32>
    %c0_74 = arith.constant 0 : index
    %c0_75 = arith.constant 0 : index
    %214 = vector.load %arg6[%c0_74, %c0_75] : memref<1x128xf32, #tpu.memory_space<vmem>>, vector<1x128xf32>
    %215 = vector.broadcast %214 : vector<1x128xf32> to vector<64x128xf32>
    %216 = arith.addf %213, %215 : vector<64x128xf32>
    %217 = tpu.iota {dimensions = array<i32: 1>} : vector<64x128xi32>
    %c0_i32_76 = arith.constant 0 : i32
    %218 = vector.broadcast %c0_i32_76 : i32 to vector<64x128xi32>
    %219 = arith.cmpi eq, %217, %218 : vector<64x128xi32>
    %220 = math.tanh %216 : vector<64x128xf32>
    %221 = arith.negf %216 : vector<64x128xf32>
    %222 = math.exp %221 : vector<64x128xf32>
    %cst_77 = arith.constant 1.000000e+00 : f32
    %223 = vector.broadcast %cst_77 : f32 to vector<64x128xf32>
    %224 = arith.addf %223, %222 : vector<64x128xf32>
    %225 = arith.divf %223, %224 : vector<64x128xf32>
    %226 = arith.select %219, %220, %225 : vector<64x128xi1>, vector<64x128xf32>
    %c0_78 = arith.constant 0 : index
    %c0_79 = arith.constant 0 : index
    %227 = vector.load %arg7[%c0_78, %c0_79] : memref<64x128xf32, #tpu.memory_space<vmem>>, vector<64x128xf32>
    tpu.vector_store %arg7[%c0_78, %c0_79], %226 {strides = array<i32>} : memref<64x128xf32, #tpu.memory_space<vmem>>, vector<64x128xf32>,
    return
  }
  func.func @transform_0(%arg0: i32) -> (i32, i32) {
    %c0_i32 = arith.constant 0 : i32
    %c0_i32_0 = arith.constant 0 : i32
    %c0_i32_1 = arith.constant 0 : i32
    return %c0_i32, %c0_i32_0 : i32, i32
  }
  func.func @transform_1(%arg0: i32) -> (i32, i32) {
    %c0_i32 = arith.constant 0 : i32
    %c0_i32_0 = arith.constant 0 : i32
    %c0_i32_1 = arith.constant 0 : i32
    return %c0_i32, %c0_i32_0 : i32, i32
  }
  func.func @transform_2(%arg0: i32) -> (i32, i32) {
    %c0_i32 = arith.constant 0 : i32
    %c0_i32_0 = arith.constant 0 : i32
    %c0_i32_1 = arith.constant 0 : i32
    return %c0_i32, %c0_i32_0 : i32, i32
  }
  func.func @transform_3(%arg0: i32) -> (i32, i32) {
    %c0_i32 = arith.constant 0 : i32
    %c0_i32_0 = arith.constant 0 : i32
    %c0_i32_1 = arith.constant 0 : i32
    return %c0_i32, %c0_i32_0 : i32, i32
  }
  func.func @transform_4(%arg0: i32) -> (i32, i32) {
    %c0_i32 = arith.constant 0 : i32
    %c0_i32_0 = arith.constant 0 : i32
    %c0_i32_1 = arith.constant 0 : i32
    return %c0_i32, %c0_i32_0 : i32, i32
  }
  func.func @transform_5(%arg0: i32) -> (i32, i32) {
    %c0_i32 = arith.constant 0 : i32
    %c0_i32_0 = arith.constant 0 : i32
    %c0_i32_1 = arith.constant 0 : i32
    return %c0_i32, %c0_i32_0 : i32, i32
  }
  func.func @transform_6(%arg0: i32) -> (i32, i32) {
    %c0_i32 = arith.constant 0 : i32
    %c0_i32_0 = arith.constant 0 : i32
    %c0_i32_1 = arith.constant 0 : i32
    return %c0_i32, %c0_i32_0 : i32, i32
  }
  func.func @transform_7(%arg0: i32) -> (i32, i32) {
    %c0_i32 = arith.constant 0 : i32
    %c0_i32_0 = arith.constant 0 : i32
    %c0_i32_1 = arith.constant 0 : i32
    return %c0_i32, %c0_i32_0 : i32, i32
  }
  func.func @transform_8(%arg0: i32) -> (i32, i32) {
    %c0_i32 = arith.constant 0 : i32
    %c0_i32_0 = arith.constant 0 : i32
    %c0_i32_1 = arith.constant 0 : i32
    return %c0_i32, %c0_i32_0 : i32, i32
  }
}

</mosaic_0001>

<bundles_post_ra>
// kernel: cond_lstm_forward.1
= control target key start
LH: loop header
LB: loop body
LE: loop exit
PB: predicated region body
PF: predicated region fallthrough
CT: control target
= control target key end

     0   :  { %v4543_v2 = vmov 0.0   ;;  %vm60_vm0 = vcmask 64512   ;;  %s4532_s1 = inlined_call_operand.vmem [shape: f32[8,512], index: 1, kind: input, shape index: {}]   ;;  %s4533_s0 = inlined_call_operand.vmem [shape: f32[64,8], index: 0, kind: input, shape index: {}]   ;;  %s4534_s2 = inlined_call_operand.vmem [shape: f32[128,512], index: 2, kind: input, shape index: {}]   ;;  %s4535_s3 = inlined_call_operand.vmem [shape: f32[1,512], index: 3, kind: input, shape index: {}]   ;;  %s4536_s4 = inlined_call_operand.vmem [shape: f32[128,128], index: 4, kind: input, shape index: {}]   ;;  %s4537_s5 = inlined_call_operand.vmem [shape: f32[1,128], index: 5, kind: input, shape index: {}]   ;;  %s4538_s8 = inlined_call_operand.vmem [shape: f32[8,128], index: 8, kind: output, shape index: {2}]   ;;  %s4539_s7 = inlined_call_operand.vmem [shape: f32[8,128], index: 7, kind: output, shape index: {1}]   ;;  %s4540_s6 = inlined_call_operand.vmem [shape: f32[64,128], index: 6, kind: output, shape index: {0}]  }
   0x1   :  { %v37_v0 = vld [vmem:[%s4532_s1 + $0x18] sm:$0xff]  ;;  %v36_v1 = vld [vmem:[%s4532_s1 + $0x10] sm:$0xff]  ;;  %262 = vmatprep.mubr.f32.mxu1 %v4543_v2  ;;  %v26_v3 = vld [vmem:[%s4533_s0] sm:$0xff]  ;;  %149 = vmatprep.mubr.f32.mxu0 %v4543_v2 }
   0x2   :  { %228 = vmatprep.subr.mxu1 %v37_v0  ;;  %v2872_v4 = vld [vmem:[%s4534_s2 + $0x1e8] sm:$0xff]  ;;  %v2877_v5 = vld [vmem:[%s4534_s2 + $0x1e0] sm:$0xff]  ;;  %v2928_v13 = vld [vmem:[%s4533_s0 + $0x10] sm:$0xff] }
   0x3   :  { %229 = vmatpush1.msra.mxu1 %v36_v1  ;;  %v2882_v6 = vld [vmem:[%s4534_s2 + $0x1c8] sm:$0xff]  ;;  %v2889_v7 = vld [vmem:[%s4534_s2 + $0x1c0] sm:$0xff]  ;;  %v2960_v18 = vld [vmem:[%s4533_s0 + $0x18] sm:$0xff] }
   0x4   :  { %2526 = vmatmul.mubr.msk.f32.vlgmr.msra.gmra.mxu1 %vm60_vm0, %v26_v3  ;;  %414 = vmatprep.subr.mxu1 %v2872_v4  ;;  %v2896_v8 = vld [vmem:[%s4533_s0 + $0x8] sm:$0xff]  ;;  %v2907_v10 = vld [vmem:[%s4534_s2 + $0x1a0] sm:$0xff]  ;;  %v3066_v35 = vld [vmem:[%s4533_s0 + $0x30] sm:$0xff] }
   0x5   :  { %415 = vmatpush1.msra.mxu1 %v2877_v5  ;;  %268 = vmatprep.mubr.f32.mxu1 %v4543_v2  ;;  %v2901_v9 = vld [vmem:[%s4534_s2 + $0x1a8] sm:$0xff]  ;;  %v2921_v12 = vld [vmem:[%s4534_s2 + $0x180] sm:$0xff]  ;;  %v3101_v40 = vld [vmem:[%s4533_s0 + $0x38] sm:$0xff] }
   0x6   :  { %416 = vmatprep.subr.mxu1 %v2882_v6  ;;  %v2913_v11 = vld [vmem:[%s4534_s2 + $0x188] sm:$0xff]  ;;  %v2939_v15 = vld [vmem:[%s4534_s2 + $0x160] sm:$0xff]  ;;  %v3135_v45 = vld [vmem:[%s4534_s2 + $0x1f8] sm:$0xff] }
   0x7   :  { %417 = vmatpush1.msra.mxu1 %v2889_v7  ;;  %v2933_v14 = vld [vmem:[%s4534_s2 + $0x168] sm:$0xff]  ;;  %v2953_v17 = vld [vmem:[%s4534_s2 + $0x140] sm:$0xff]  ;;  %4632 = vst [vmem:[#allocation15_spill] sm:$0xff] %v3135_v45  ;;  %v3141_v46 = vld [vmem:[%s4534_s2 + $0x1f0] sm:$0xff] }
   0x8   :  { %2527 = vmatmul.mubr.msk.f32.gmra.mxu1 %vm60_vm0, %v2896_v8  ;;  %418 = vmatprep.subr.mxu1 %v2901_v9  ;;  %v2945_v16 = vld [vmem:[%s4534_s2 + $0x148] sm:$0xff]  ;;  %v2974_v21 = vld [vmem:[%s4534_s2 + $0x120] sm:$0xff]  ;;  %v3148_v47 = vld [vmem:[%s4534_s2 + $0x1d8] sm:$0xff] }
   0x9   :  { %419 = vmatpush1.msra.mxu1 %v2907_v10  ;;  %274 = vmatprep.mubr.f32.mxu1 %v4543_v2  ;;  %v2965_v19 = vld [vmem:[%s4534_s2 + $0x128] sm:$0xff]  ;;  %v34_v22 = vld [vmem:[%s4532_s1] sm:$0xff]  ;;  %v3156_v48 = vld [vmem:[%s4534_s2 + $0x1d0] sm:$0xff] }
   0xa   :  { %420 = vmatprep.subr.mxu1 %v2913_v11  ;;  %v35_v20 = vld [vmem:[%s4532_s1 + $0x8] sm:$0xff]  ;;  %v2991_v24 = vld [vmem:[%s4534_s2 + $0x100] sm:$0xff]  ;;  %v3162_v49 = vld [vmem:[%s4534_s2 + $0x1b8] sm:$0xff] }
   0xb   :  { %421 = vmatpush1.msra.mxu1 %v2921_v12  ;;  %115 = vmatprep.subr.mxu0 %v35_v20  ;;  %v2983_v23 = vld [vmem:[%s4534_s2 + $0x108] sm:$0xff]  ;;  %v2998_v25 = vld [vmem:[%s4533_s0 + $0x20] sm:$0xff]  ;;  %v3169_v50 = vld [vmem:[%s4534_s2 + $0x1b0] sm:$0xff] }
   0xc   :  { %2528 = vmatmul.mubr.msk.f32.gmra.mxu1 %vm60_vm0, %v2928_v13  ;;  %422 = vmatprep.subr.mxu1 %v2933_v14  ;;  %v3003_v26 = vld [vmem:[%s4534_s2 + $0xe8] sm:$0xff]  ;;  %v3009_v27 = vld [vmem:[%s4534_s2 + $0xe0] sm:$0xff]  ;;  %v3176_v51 = vld [vmem:[%s4534_s2 + $0x198] sm:$0xff] }
   0xd   :  { %423 = vmatpush1.msra.mxu1 %v2939_v15  ;;  %280 = vmatprep.mubr.f32.mxu1 %v4543_v2  ;;  %v3016_v28 = vld [vmem:[%s4534_s2 + $0xc8] sm:$0xff]  ;;  %v3025_v29 = vld [vmem:[%s4534_s2 + $0xc0] sm:$0xff]  ;;  %v3184_v52 = vld [vmem:[%s4534_s2 + $0x190] sm:$0xff] }
   0xe   :  { %424 = vmatprep.subr.mxu1 %v2945_v16  ;;  %116 = vmatpush1.msra.mxu0 %v34_v22  ;;  %v3032_v30 = vld [vmem:[%s4533_s0 + $0x28] sm:$0xff]  ;;  %v3043_v32 = vld [vmem:[%s4534_s2 + $0xa0] sm:$0xff]  ;;  %v3191_v53 = vld [vmem:[%s4534_s2 + $0x178] sm:$0xff] }
   0xf   :  { %425 = vmatpush1.msra.mxu1 %v2953_v17  ;;  %2518 = vmatmul.mubr.msk.f32.vlgmr.msra.gmra.mxu0 %vm60_vm0, %v26_v3  ;;  %v3037_v31 = vld [vmem:[%s4534_s2 + $0xa8] sm:$0xff]  ;;  %4622 = vst [vmem:[#allocation5_spill] sm:$0xff] %v3043_v32  ;;  %v3059_v34 = vld [vmem:[%s4534_s2 + $0x80] sm:$0xff]  ;;  %v3198_v54 = vld [vmem:[%s4534_s2 + $0x170] sm:$0xff] }
  0x10   :  { %2529 = vmatmul.mubr.msk.f32.gmra.mxu1 %vm60_vm0, %v2960_v18  ;;  %426 = vmatprep.subr.mxu1 %v2965_v19  ;;  %4621 = vst [vmem:[#allocation4_spill] sm:$0xff] %v3037_v31  ;;  %v3050_v33 = vld [vmem:[%s4534_s2 + $0x88] sm:$0xff]  ;;  %4623 = vst [vmem:[#allocation6_spill] sm:$0xff] %v3059_v34  ;;  %v3077_v37 = vld [vmem:[%s4534_s2 + $0x60] sm:$0xff] }
  0x11   :  { %427 = vmatpush1.msra.mxu1 %v2974_v21  ;;  %286 = vmatprep.mubr.f32.mxu1 %v4543_v2  ;;  %v3071_v36 = vld [vmem:[%s4534_s2 + $0x68] sm:$0xff]  ;;  %4625 = vst [vmem:[#allocation8_spill] sm:$0xff] %v3077_v37  ;;  %v3094_v39 = vld [vmem:[%s4534_s2 + $0x40] sm:$0xff]  ;;  %v3205_v55 = vld [vmem:[%s4534_s2 + $0x158] sm:$0xff] }
  0x12   :  { %428 = vmatprep.subr.mxu1 %v2983_v23  ;;  %656 = vmatprep.subr.mxu0 %v2872_v4  ;;  %4624 = vst [vmem:[#allocation7_spill] sm:$0xff] %v3071_v36  ;;  %v3084_v38 = vld [vmem:[%s4534_s2 + $0x48] sm:$0xff]  ;;  %4627 = vst [vmem:[#allocation10_spill] sm:$0xff] %v3094_v39  ;;  %v3112_v42 = vld [vmem:[%s4534_s2 + $0x20] sm:$0xff] }
  0x13   :  { %429 = vmatpush1.msra.mxu1 %v2991_v24  ;;  %657 = vmatpush1.msra.mxu0 %v2877_v5  ;;  %4626 = vst [vmem:[#allocation9_spill] sm:$0xff] %v3084_v38  ;;  %v3106_v41 = vld [vmem:[%s4534_s2 + $0x28] sm:$0xff]  ;;  %4629 = vst [vmem:[#allocation12_spill] sm:$0xff] %v3112_v42  ;;  %v3128_v44 = vld [vmem:[%s4534_s2] sm:$0xff] }
  0x14   :  { %2530 = vmatmul.mubr.msk.f32.gmra.mxu1 %vm60_vm0, %v2998_v25  ;;  %430 = vmatprep.subr.mxu1 %v3003_v26  ;;  %4628 = vst [vmem:[#allocation11_spill] sm:$0xff] %v3106_v41  ;;  %v3119_v43 = vld [vmem:[%s4534_s2 + $0x8] sm:$0xff]  ;;  %4631 = vst [vmem:[#allocation14_spill] sm:$0xff] %v3128_v44  ;;  %v3212_v56 = vld [vmem:[%s4534_s2 + $0x150] sm:$0xff] }
  0x15   :  { %431 = vmatpush1.msra.mxu1 %v3009_v27  ;;  %292 = vmatprep.mubr.f32.mxu1 %v4543_v2  ;;  %4630 = vst [vmem:[#allocation13_spill] sm:$0xff] %v3119_v43  ;;  %v3219_v57 = vld [vmem:[%s4534_s2 + $0x138] sm:$0xff]  ;;  %v3227_v58 = vld [vmem:[%s4534_s2 + $0x130] sm:$0xff] }
  0x16   :  { %432 = vmatprep.subr.mxu1 %v3016_v28  ;;  %155 = vmatprep.mubr.f32.mxu0 %v4543_v2  ;;  %v3234_v59 = vld [vmem:[%s4534_s2 + $0x118] sm:$0xff]  ;;  %v3241_v60 = vld [vmem:[%s4534_s2 + $0x110] sm:$0xff] }
  0x17   :  { %433 = vmatpush1.msra.mxu1 %v3025_v29  ;;  %658 = vmatprep.subr.mxu0 %v2882_v6  ;;  %v3248_v61 = vld [vmem:[%s4534_s2 + $0xf8] sm:$0xff]  ;;  %v3255_v62 = vld [vmem:[%s4534_s2 + $0xf0] sm:$0xff] }
  0x18   :  { %2531 = vmatmul.mubr.msk.f32.gmra.mxu1 %vm60_vm0, %v3032_v30  ;;  %434 = vmatprep.subr.mxu1 %v3037_v31  ;;  %v3262_v63 = vld [vmem:[%s4534_s2 + $0xd8] sm:$0xff]  ;;  %v3270_v0 = vld [vmem:[%s4534_s2 + $0xd0] sm:$0xff] }
  0x19   :  { %435 = vmatpush1.msra.mxu1 %v3043_v32  ;;  %298 = vmatprep.mubr.f32.mxu1 %v4543_v2  ;;  %v3277_v1 = vld [vmem:[%s4534_s2 + $0xb8] sm:$0xff]  ;;  %v3284_v3 = vld [vmem:[%s4534_s2 + $0xb0] sm:$0xff] }
  0x1a   :  { %436 = vmatprep.subr.mxu1 %v3050_v33  ;;  %2519 = vmatmul.mubr.msk.f32.gmra.mxu0 %vm60_vm0, %v2896_v8  ;;  %v3291_v8 = vld [vmem:[%s4534_s2 + $0x98] sm:$0xff]  ;;  %v3313_v20 = vld [vmem:[%s4534_s2 + $0x70] sm:$0xff] }
  0x1b   :  { %437 = vmatpush1.msra.mxu1 %v3059_v34  ;;  %659 = vmatpush1.msra.mxu0 %v2889_v7  ;;  %4633 = vst [vmem:[#allocation16_spill] sm:$0xff] %v3291_v8  ;;  %4636 = vst [vmem:[#allocation19_spill] sm:$0xff] %v3313_v20  ;;  %v3320_v22 = vld [vmem:[%s4534_s2 + $0x58] sm:$0xff] }
  0x1c   :  { %2532 = vmatmul.mubr.msk.f32.gmra.mxu1 %vm60_vm0, %v3066_v35  ;;  %438 = vmatprep.subr.mxu1 %v3071_v36  ;;  %4637 = vst [vmem:[#allocation20_spill] sm:$0xff] %v3320_v22 }
  0x1d   :  { %439 = vmatpush1.msra.mxu1 %v3077_v37  ;;  %304 = vmatprep.mubr.f32.mxu1 %v4543_v2 }
  0x1e   :  { %440 = vmatprep.subr.mxu1 %v3084_v38  ;;  %660 = vmatprep.subr.mxu0 %v2901_v9 }
  0x1f   :  { %441 = vmatpush1.msra.mxu1 %v3094_v39  ;;  %661 = vmatpush1.msra.mxu0 %v2907_v10 }
  0x20   :  { %2533 = vmatmul.mubr.msk.f32.gmra.mxu1 %vm60_vm0, %v3101_v40  ;;  %442 = vmatprep.subr.mxu1 %v3106_v41 }
  0x21   :  { %443 = vmatpush1.msra.mxu1 %v3112_v42  ;;  %478 = vmatprep.mubr.f32.mxu1 %v4543_v2 }
  0x22   :  { %444 = vmatprep.subr.mxu1 %v3119_v43  ;;  %161 = vmatprep.mubr.f32.mxu0 %v4543_v2 }
  0x23   :  { %445 = vmatpush1.msra.mxu1 %v3128_v44  ;;  %662 = vmatprep.subr.mxu0 %v2913_v11 }
  0x24   :  { %479 = vmatmul.mubr.f32.vlgmr.msra.gmra.mxu1 %v4543_v2  ;;  %485 = vmatprep.subr.mxu1 %v3135_v45 }
  0x25   :  { %486 = vmatpush1.msra.mxu1 %v3141_v46  ;;  %549 = vmatprep.mubr.f32.mxu1 %v4543_v2 }
  0x26   :  { %487 = vmatprep.subr.mxu1 %v3148_v47  ;;  %2520 = vmatmul.mubr.msk.f32.gmra.mxu0 %vm60_vm0, %v2928_v13  ;;  %v3298_v13 = vld [vmem:[%s4534_s2 + $0x90] sm:$0xff] }
  0x27   :  { %488 = vmatpush1.msra.mxu1 %v3156_v48  ;;  %663 = vmatpush1.msra.mxu0 %v2921_v12  ;;  %4634 = vst [vmem:[#allocation17_spill] sm:$0xff] %v3298_v13 }
  0x28   :  { %489 = vmatprep.subr.mxu1 %v3162_v49  ;;  %664 = vmatprep.subr.mxu0 %v2933_v14 }
  0x29   :  { %490 = vmatpush1.msra.mxu1 %v3169_v50  ;;  %665 = vmatpush1.msra.mxu0 %v2939_v15 }
  0x2a   :  { %491 = vmatprep.subr.mxu1 %v3176_v51  ;;  %167 = vmatprep.mubr.f32.mxu0 %v4543_v2 }
  0x2b   :  { %492 = vmatpush1.msra.mxu1 %v3184_v52  ;;  %666 = vmatprep.subr.mxu0 %v2945_v16 }
  0x2c   :  { %493 = vmatprep.subr.mxu1 %v3191_v53  ;;  %2521 = vmatmul.mubr.msk.f32.gmra.mxu0 %vm60_vm0, %v2960_v18  ;;  %v3305_v18 = vld [vmem:[%s4534_s2 + $0x78] sm:$0xff] }
  0x2d   :  { %494 = vmatpush1.msra.mxu1 %v3198_v54  ;;  %667 = vmatpush1.msra.mxu0 %v2953_v17  ;;  %4635 = vst [vmem:[#allocation18_spill] sm:$0xff] %v3305_v18 }
  0x2e   :  { %495 = vmatprep.subr.mxu1 %v3205_v55  ;;  %668 = vmatprep.subr.mxu0 %v2965_v19 }
  0x2f   :  { %496 = vmatpush1.msra.mxu1 %v3212_v56  ;;  %669 = vmatpush1.msra.mxu0 %v2974_v21 }
  0x30   :  { %497 = vmatprep.subr.mxu1 %v3219_v57  ;;  %173 = vmatprep.mubr.f32.mxu0 %v4543_v2 }
  0x31   :  { %498 = vmatpush1.msra.mxu1 %v3227_v58  ;;  %670 = vmatprep.subr.mxu0 %v2983_v23 }
  0x32   :  { %499 = vmatprep.subr.mxu1 %v3234_v59  ;;  %2522 = vmatmul.mubr.msk.f32.gmra.mxu0 %vm60_vm0, %v2998_v25  ;;  %v3327_v25 = vld [vmem:[%s4534_s2 + $0x50] sm:$0xff] }
  0x33   :  { %500 = vmatpush1.msra.mxu1 %v3241_v60  ;;  %671 = vmatpush1.msra.mxu0 %v2991_v24  ;;  %4638 = vst [vmem:[#allocation21_spill] sm:$0xff] %v3327_v25 }
  0x34   :  { %501 = vmatprep.subr.mxu1 %v3248_v61  ;;  %672 = vmatprep.subr.mxu0 %v3003_v26 }
  0x35   :  { %502 = vmatpush1.msra.mxu1 %v3255_v62  ;;  %673 = vmatpush1.msra.mxu0 %v3009_v27 }
  0x36   :  { %503 = vmatprep.subr.mxu1 %v3262_v63  ;;  %179 = vmatprep.mubr.f32.mxu0 %v4543_v2 }
  0x37   :  { %504 = vmatpush1.msra.mxu1 %v3270_v0  ;;  %674 = vmatprep.subr.mxu0 %v3016_v28 }
  0x38   :  { %505 = vmatprep.subr.mxu1 %v3277_v1  ;;  %2523 = vmatmul.mubr.msk.f32.gmra.mxu0 %vm60_vm0, %v3032_v30  ;;  %v3334_v30 = vld [vmem:[%s4534_s2 + $0x38] sm:$0xff] }
  0x39   :  { %506 = vmatpush1.msra.mxu1 %v3284_v3  ;;  %675 = vmatpush1.msra.mxu0 %v3025_v29  ;;  %4639 = vst [vmem:[#allocation22_spill] sm:$0xff] %v3334_v30 }
  0x3a   :  { %507 = vmatprep.subr.mxu1 %v3291_v8  ;;  %676 = vmatprep.subr.mxu0 %v3037_v31  ;;  %v3341_v31 = vld [vmem:[%s4534_s2 + $0x30] sm:$0xff] }
  0x3b   :  { %508 = vmatpush1.msra.mxu1 %v3298_v13  ;;  %677 = vmatpush1.msra.mxu0 %v3043_v32  ;;  %4640 = vst [vmem:[#allocation23_spill] sm:$0xff] %v3341_v31  ;;  %v3348_v32 = vld [vmem:[%s4534_s2 + $0x18] sm:$0xff] }
  0x3c   :  { %509 = vmatprep.subr.mxu1 %v3305_v18  ;;  %185 = vmatprep.mubr.f32.mxu0 %v4543_v2  ;;  %4641 = vst [vmem:[#allocation24_spill] sm:$0xff] %v3348_v32  ;;  %v3356_v2 = vld [vmem:[%s4534_s2 + $0x10] sm:$0xff] }
  0x3d   :  { %510 = vmatpush1.msra.mxu1 %v3313_v20  ;;  %678 = vmatprep.subr.mxu0 %v3050_v33  ;;  %4642 = vst [vmem:[#allocation25_spill] sm:$0xff] %v3356_v2 }
  0x3e   :  { %511 = vmatprep.subr.mxu1 %v3320_v22  ;;  %2524 = vmatmul.mubr.msk.f32.gmra.mxu0 %vm60_vm0, %v3066_v35  ;;  %v4643_v35 = vmov 0.0  }
  0x3f   :  { %512 = vmatpush1.msra.mxu1 %v3327_v25  ;;  %679 = vmatpush1.msra.mxu0 %v3059_v34 }
  0x40   :  { %513 = vmatprep.subr.mxu1 %v3334_v30  ;;  %680 = vmatprep.subr.mxu0 %v3071_v36 }
  0x41   :  { %514 = vmatpush1.msra.mxu1 %v3341_v31  ;;  %681 = vmatpush1.msra.mxu0 %v3077_v37 }
  0x42   :  { %515 = vmatprep.subr.mxu1 %v3348_v32  ;;  %191 = vmatprep.mubr.f32.mxu0 %v4643_v35 }
  0x43   :  { %516 = vmatpush1.msra.mxu1 %v3356_v2  ;;  %682 = vmatprep.subr.mxu0 %v3084_v38 }
  0x44   :  { %550 = vmatmul.mubr.f32.vlgmr.msra.gmra.mxu1 %v4643_v35  ;;  %727 = vmatprep.subr.mxu1 %v3135_v45 }
  0x45   :  { %728 = vmatpush1.msra.mxu1 %v3141_v46  ;;  %2525 = vmatmul.mubr.msk.f32.gmra.mxu0 %vm60_vm0, %v3101_v40 }
  0x46   :  { %729 = vmatprep.subr.mxu1 %v3148_v47  ;;  %683 = vmatpush1.msra.mxu0 %v3094_v39 }
  0x47   :  { %730 = vmatpush1.msra.mxu1 %v3156_v48  ;;  %684 = vmatprep.subr.mxu0 %v3106_v41 }
  0x48   :  { %731 = vmatprep.subr.mxu1 %v3162_v49  ;;  %685 = vmatpush1.msra.mxu0 %v3112_v42 }
  0x49   :  { %732 = vmatpush1.msra.mxu1 %v3169_v50  ;;  %686 = vmatprep.subr.mxu0 %v3119_v43 }
  0x4a   :  { %733 = vmatprep.subr.mxu1 %v3176_v51  ;;  %687 = vmatpush1.msra.mxu0 %v3128_v44  ;;  %v38_v44 = vld [vmem:[%s4535_s3] sm:$0xf] }
  0x4b   :  { %734 = vmatpush1.msra.mxu1 %v3184_v52  ;;  %720 = vmatprep.mubr.f32.mxu0 %v4643_v35 }
  0x4c   :  { %735 = vmatprep.subr.mxu1 %v3191_v53  ;;  %791 = vmatprep.mubr.f32.mxu1 %v4643_v35 }
  0x4d   :  { %736 = vmatpush1.msra.mxu1 %v3198_v54  ;;  %899 = vmatprep.subr.mxu0 %v2872_v4  ;;  %v4555_v4 = vlaneseq }
  0x4e   :  { %737 = vmatprep.subr.mxu1 %v3205_v55 }
  0x4f   :  { %738 = vmatpush1.msra.mxu1 %v3212_v56  ;;  %v41_v40 = vshrl.u32 %v4555_v4, 7 }
  0x50   :  { %739 = vmatprep.subr.mxu1 %v3219_v57 }
  0x51   :  { %740 = vmatpush1.msra.mxu1 %v3227_v58  ;;  %v50_v35 = vsub.s32 2, %v41_v40  ;;  %v54_v42 = vsub.s32 3, %v41_v40 }
  0x52   :  { %741 = vmatprep.subr.mxu1 %v3234_v59 }
  0x53   :  { %742 = vmatpush1.msra.mxu1 %v3241_v60  ;;  %v3420_v41 = vrot.slane %v38_v44, %v54_v42 }
  0x54   :  { %743 = vmatprep.subr.mxu1 %v3248_v61 }
  0x55   :  { %744 = vmatpush1.msra.mxu1 %v3255_v62 }
  0x56   :  { %745 = vmatprep.subr.mxu1 %v3262_v63 }
  0x57   :  { %746 = vmatpush1.msra.mxu1 %v3270_v0 }
  0x58   :  { %747 = vmatprep.subr.mxu1 %v3277_v1 }
  0x59   :  { %748 = vmatpush1.msra.mxu1 %v3284_v3 }
  0x5a   :  { %749 = vmatprep.subr.mxu1 %v3291_v8 }
  0x5b   :  { %750 = vmatpush1.msra.mxu1 %v3298_v13 }
  0x5c   :  { %751 = vmatprep.subr.mxu1 %v3305_v18 }
  0x5d   :  { %752 = vmatpush1.msra.mxu1 %v3313_v20 }
  0x5e   :  { %753 = vmatprep.subr.mxu1 %v3320_v22 }
  0x5f   :  { %754 = vmatpush1.msra.mxu1 %v3327_v25 }
  0x60   :  { %755 = vmatprep.subr.mxu1 %v3334_v30 }
  0x61   :  { %756 = vmatpush1.msra.mxu1 %v3341_v31  ;;  %v3418_v31 = vrot.slane %v38_v44, %v50_v35 }
  0x62   :  { %757 = vmatprep.subr.mxu1 %v3348_v32 }
  0x63   :  { %758 = vmatpush1.msra.mxu1 %v3356_v2 }
  0x64   :  { %970 = vmatprep.subr.mxu1 %v3135_v45 }
  0xc4   :  { %v3414_v43 = vpop.f32.mrf.mxu1 }
  0xc6   :  { %v3416_v30 = vpop.f32.mrf.mxu1 }
  0xc8   :  { %v270_v32 = vpop.f32.mrf.mxu1 }
  0xc9   :  { %v3423_v45 = vadd.f32 %v270_v32, %v3418_v31 }
  0xca   :  { %v272_v2 = vpop.f32.mrf.mxu1 }
  0xcb   :  { %4644 = vst [vmem:[#allocation26_spill] sm:$0xff] %v3423_v45  ;;  %v3426_v4 = vadd.f32 %v272_v2, %v3420_v41 }
  0xcc   :  { %v276_v25 = vpop.f32.mrf.mxu1 }
  0xcd   :  { %4645 = vst [vmem:[#allocation27_spill] sm:$0xff] %v3426_v4  ;;  %v3429_v39 = vadd.f32 %v276_v25, %v3418_v31 }
  0xce   :  { %v278_v22 = vpop.f32.mrf.mxu1 }
  0xcf   :  { %4646 = vst [vmem:[#allocation28_spill] sm:$0xff] %v3429_v39  ;;  %v3432_v38 = vadd.f32 %v278_v22, %v3420_v41 }
  0xd0   :  { %v282_v35 = vpop.f32.mrf.mxu1 }
  0xd1   :  { %4647 = vst [vmem:[#allocation29_spill] sm:$0xff] %v3432_v38  ;;  %v3435_v20 = vadd.f32 %v282_v35, %v3418_v31  ;;  %v151_v38 = vpop.f32.mrf.mxu0 }
  0xd2   :  { %v284_v42 = vpop.f32.mrf.mxu1 }
  0xd3   :  { %4648 = vst [vmem:[#allocation30_spill] sm:$0xff] %v3435_v20  ;;  %v3438_v32 = vadd.f32 %v284_v42, %v3420_v41 }
  0xd4   :  { %v288_v45 = vpop.f32.mrf.mxu1 }
  0xd5   :  { %4649 = vst [vmem:[#allocation31_spill] sm:$0xff] %v3438_v32  ;;  %v3441_v2 = vadd.f32 %v288_v45, %v3418_v31  ;;  %v153_v32 = vpop.f32.mrf.mxu0 }
  0xd6   :  { %v290_v4 = vpop.f32.mrf.mxu1 }
  0xd7   :  { %4650 = vst [vmem:[#allocation32_spill] sm:$0xff] %v3441_v2  ;;  %v3444_v25 = vadd.f32 %v290_v4, %v3420_v41  ;;  %v42_v4 = vsub.s32 0, %v41_v40 }
  0xd8   :  { %v294_v39 = vpop.f32.mrf.mxu1 }
  0xd9   :  { %4651 = vst [vmem:[#allocation33_spill] sm:$0xff] %v3444_v25  ;;  %v3447_v22 = vadd.f32 %v294_v39, %v3418_v31  ;;  %v46_v39 = vsub.s32 1, %v41_v40 }
  0xda   :  { %v296_v37 = vpop.f32.mrf.mxu1  ;;  %v3458_v25 = vpop.f32.mrf.mxu0 }
  0xdb   :  { %4652 = vst [vmem:[#allocation34_spill] sm:$0xff] %v3447_v22  ;;  %v3450_v35 = vadd.f32 %v296_v37, %v3420_v41  ;;  %4656 = vst [vmem:[#allocation38_spill] sm:$0xff] %v3458_v25  ;;  %v3463_v37 = vrot.slane %v38_v44, %v42_v4 }
  0xdc   :  { %v300_v20 = vpop.f32.mrf.mxu1 }
  0xdd   :  { %4653 = vst [vmem:[#allocation35_spill] sm:$0xff] %v3450_v35  ;;  %v3453_v42 = vadd.f32 %v300_v20, %v3418_v31  ;;  %v3468_v20 = vpop.f32.mrf.mxu0 }
  0xde   :  { %v302_v45 = vpop.f32.mrf.mxu1  ;;  %4659 = vst [vmem:[#allocation41_spill] sm:$0xff] %v3468_v20 }
  0xdf   :  { %4654 = vst [vmem:[#allocation36_spill] sm:$0xff] %v3453_v42  ;;  %v3456_v2 = vadd.f32 %v302_v45, %v3420_v41  ;;  %v3470_v42 = vrot.slane %v38_v44, %v46_v39 }
  0xe0   :  { %v306_v18 = vpop.f32.mrf.mxu1 }
  0xe1   :  { %4655 = vst [vmem:[#allocation37_spill] sm:$0xff] %v3456_v2  ;;  %v3461_v22 = vadd.f32 %v306_v18, %v3418_v31  ;;  %4660 = vst [vmem:[#allocation42_spill] sm:$0xff] %v3470_v42  ;;  %v152_v2 = vadd.f32 %v151_v38, %v3463_v37  ;;  %v154_v25 = vadd.f32 %v153_v32, %v3470_v42 }
  0xe2   :  { %v308_v36 = vpop.f32.mrf.mxu1 }
  0xe3   :  { %4657 = vst [vmem:[#allocation39_spill] sm:$0xff] %v3461_v22  ;;  %v3466_v35 = vadd.f32 %v308_v36, %v3420_v41 }
  0xe4   :  { %v480_v45 = vpop.f32.mrf.mxu1 }
  0xe5   :  { %4658 = vst [vmem:[#allocation40_spill] sm:$0xff] %v3466_v35  ;;  %v556_v36 = vadd.f32 %v480_v45, %v152_v2 }
  0xe6   :  { %v163_v13 = vpop.f32.mrf.mxu0  ;;  %v482_v18 = vpop.f32.mrf.mxu1 }
  0xe7   :  { %v3475_v40 = vadd.f32 %v163_v13, %v3463_v37  ;;  %v557_v35 = vadd.f32 %v482_v18, %v154_v25  ;;  %v2534_v39 = vmul.f32 -1.442695, %v556_v36 }
  0xe8   :  { %v165_v22 = vpop.f32.mrf.mxu0 }
  0xe9   :  { %v3478_v4 = vadd.f32 %v165_v22, %v3470_v42  ;;  %v2535_v38 = vmul.f32 -1.442695, %v557_v35  ;;  %2636 = vpow2.f32 %v2534_v39 }
  0xeb   :  { %4661 = vst [vmem:[#allocation43_spill] sm:$0xff] %v3478_v4  ;;  %2638 = vpow2.f32 %v2535_v38 }
  0xec   :  { %v169_v34 = vpop.f32.mrf.mxu0 }
  0xed   :  { %v3481_v44 = vadd.f32 %v169_v34, %v3463_v37 }
  0xee   :  { %v171_v20 = vpop.f32.mrf.mxu0 }
  0xef   :  { %4662 = vst [vmem:[#allocation44_spill] sm:$0xff] %v3481_v44  ;;  %v3484_v8 = vadd.f32 %v171_v20, %v3470_v42 }
  0xf1   :  { %4663 = vst [vmem:[#allocation45_spill] sm:$0xff] %v3484_v8 }
  0xf2   :  { %v175_v13 = vpop.f32.mrf.mxu0 }
  0xf3   :  { %v3487_v32 = vadd.f32 %v175_v13, %v3463_v37 }
  0xf4   :  { %v177_v22 = vpop.f32.mrf.mxu0 }
  0xf5   :  { %4664 = vst [vmem:[#allocation46_spill] sm:$0xff] %v3487_v32  ;;  %v3490_v2 = vadd.f32 %v177_v22, %v3470_v42  ;;  %v265_v22 = vadd.f32 %v3414_v43, %v3418_v31 }
  0xf6   :  { %v2637_v18 = vpop.eup %2636 }
  0xf7   :  { %4665 = vst [vmem:[#allocation47_spill] sm:$0xff] %v3490_v2  ;;  %v569_v2 = vadd.f32 1.0, %v2637_v18 }
  0xf8   :  { %v181_v25 = vpop.f32.mrf.mxu0  ;;  %v2639_v39 = vpop.eup %2638 }
  0xf9   :  { %v3493_v34 = vadd.f32 %v181_v25, %v3463_v37  ;;  %v570_v25 = vadd.f32 1.0, %v2639_v39  ;;  %2640 = vrcp.f32 %v569_v2 }
  0xfa   :  { %v183_v45 = vpop.f32.mrf.mxu0 }
  0xfb   :  { %4666 = vst [vmem:[#allocation48_spill] sm:$0xff] %v3493_v34  ;;  %v3496_v35 = vadd.f32 %v183_v45, %v3470_v42  ;;  %v267_v45 = vadd.f32 %v3416_v30, %v3420_v41  ;;  %2642 = vrcp.f32 %v570_v25 }
  0xfd   :  { %4667 = vst [vmem:[#allocation49_spill] sm:$0xff] %v3496_v35 }
  0xfe   :  { %v187_v20 = vpop.f32.mrf.mxu0 }
  0xff   :  { %v3499_v36 = vadd.f32 %v187_v20, %v3463_v37 }
 0x100   :  { %v189_v38 = vpop.f32.mrf.mxu0 }
 0x101   :  { %4668 = vst [vmem:[#allocation50_spill] sm:$0xff] %v3499_v36  ;;  %v3502_v13 = vadd.f32 %v189_v38, %v3470_v42 }
 0x103   :  { %4669 = vst [vmem:[#allocation51_spill] sm:$0xff] %v3502_v13 }
 0x104   :  { %v551_v34 = vpop.f32.mrf.mxu1 }
 0x105   :  { %v558_v35 = vadd.f32 %v551_v34, %v265_v22  ;;  %v193_v8 = vpop.f32.mrf.mxu0 }
 0x106   :  { %v553_v32 = vpop.f32.mrf.mxu1  ;;  %v3509_v44 = vadd.f32 %v193_v8, %v3463_v37  ;;  %v2641_v38 = vpop.eup %2640 }
 0x107   :  { %v2536_v20 = vmul.f32 -1.442695, %v558_v35  ;;  %v559_v36 = vadd.f32 %v553_v32, %v267_v45  ;;  %v4699_v35 = vld [vmem:[#allocation27_spill] sm:$0xff] }
 0x108   :  { %4670 = vst [vmem:[#allocation52_spill] sm:$0xff] %v3509_v44  ;;  %v2643_v31 = vpop.eup %2642  ;;  %v3941_v44 = vld [vmem:[%s4534_s2] sm:$0xff] }
 0x109   :  { %2644 = vpow2.f32 %v2536_v20  ;;  %v579_v13 = vmul.f32 0.0, %v2643_v31 }
 0x10a   :  { %2646 = vtanh.f32 %v559_v36 }
 0x116   :  { %v2645_v43 = vpop.eup %2644 }
 0x117   :  { %v2647_v18 = vpop.eup %2646  ;;  %v571_v39 = vadd.f32 1.0, %v2645_v43 }
 0x118   :  { %v580_v4 = vmul.f32 %v2647_v18, %v2641_v38 }
 0x119   :  { %2648 = vrcp.f32 %v571_v39 }
 0x11a   :  { %v3511_v41 = vadd.f32 %v580_v4, %v579_v13 }
 0x11c   :  { %2650 = vtanh.f32 %v3511_v41 }
 0x126   :  { %v2649_v30 = vpop.eup %2648 }
 0x129   :  { %v2651_v32 = vpop.eup %2650 }
 0x12a   :  { %v3514_v2 = vmul.f32 %v2651_v32, %v2649_v30 }
 0x12c   :  { %4671 = vst [vmem:[#allocation53_spill] sm:$0xff] %v3514_v2  ;;  %721 = vmatmul.mubr.f32.vlgmr.msra.gmra.mxu0 %v3514_v2  ;;  %792 = vmatmul.mubr.f32.vlgmr.msra.gmra.mxu1 %v3514_v2 }
 0x12d   :  { %900 = vmatpush1.msra.mxu0 %v2877_v5  ;;  %971 = vmatpush1.msra.mxu1 %v3141_v46  ;;  %v4672_v5 = vld [vmem:[#allocation4_spill] sm:$0xff] }
 0x12e   :  { %901 = vmatprep.subr.mxu0 %v2882_v6  ;;  %972 = vmatprep.subr.mxu1 %v3148_v47  ;;  %v4673_v6 = vld [vmem:[#allocation5_spill] sm:$0xff] }
 0x12f   :  { %902 = vmatpush1.msra.mxu0 %v2889_v7  ;;  %973 = vmatpush1.msra.mxu1 %v3156_v48  ;;  %v4674_v7 = vld [vmem:[#allocation16_spill] sm:$0xff] }
 0x130   :  { %903 = vmatprep.subr.mxu0 %v2901_v9  ;;  %974 = vmatprep.subr.mxu1 %v3162_v49  ;;  %v4675_v9 = vld [vmem:[#allocation6_spill] sm:$0xff] }
 0x131   :  { %904 = vmatpush1.msra.mxu0 %v2907_v10  ;;  %975 = vmatpush1.msra.mxu1 %v3169_v50  ;;  %v4676_v10 = vld [vmem:[#allocation17_spill] sm:$0xff] }
 0x132   :  { %905 = vmatprep.subr.mxu0 %v2913_v11  ;;  %976 = vmatprep.subr.mxu1 %v3176_v51  ;;  %v4677_v11 = vld [vmem:[#allocation7_spill] sm:$0xff]  ;;  %v4692_v51 = vmov 0.0  }
 0x133   :  { %906 = vmatpush1.msra.mxu0 %v2921_v12  ;;  %977 = vmatpush1.msra.mxu1 %v3184_v52  ;;  %v4678_v12 = vld [vmem:[#allocation18_spill] sm:$0xff]  ;;  %v4693_v52 = vld [vmem:[#allocation25_spill] sm:$0xff] }
 0x134   :  { %907 = vmatprep.subr.mxu0 %v2933_v14  ;;  %978 = vmatprep.subr.mxu1 %v3191_v53  ;;  %v4679_v14 = vld [vmem:[#allocation8_spill] sm:$0xff]  ;;  %v4694_v53 = vld [vmem:[#allocation15_spill] sm:$0xff] }
 0x135   :  { %908 = vmatpush1.msra.mxu0 %v2939_v15  ;;  %979 = vmatpush1.msra.mxu1 %v3198_v54  ;;  %v4680_v15 = vld [vmem:[#allocation19_spill] sm:$0xff]  ;;  %v3583_v54 = vpop.f32.mrf.mxu0 }
 0x136   :  { %909 = vmatprep.subr.mxu0 %v2945_v16  ;;  %980 = vmatprep.subr.mxu1 %v3205_v55  ;;  %v4681_v16 = vld [vmem:[#allocation9_spill] sm:$0xff]  ;;  %4695 = vst [vmem:[#allocation4_spill] sm:$0xff] %v3583_v54  ;;  %v4696_v55 = vld [vmem:[#allocation38_spill] sm:$0xff] }
 0x137   :  { %910 = vmatpush1.msra.mxu0 %v2953_v17  ;;  %981 = vmatpush1.msra.mxu1 %v3212_v56  ;;  %v4682_v17 = vld [vmem:[#allocation20_spill] sm:$0xff]  ;;  %v158_v56 = vadd.f32 %v4696_v55, %v3463_v37  ;;  %v3763_v55 = vld [vmem:[%s4534_s2 + $0xe8] sm:$0xff]  ;;  %v3946_v54 = vld [vmem:[%s4534_s2 + $0x10] sm:$0xff] }
 0x138   :  { %911 = vmatprep.subr.mxu0 %v2965_v19  ;;  %982 = vmatprep.subr.mxu1 %v3219_v57  ;;  %v4683_v19 = vld [vmem:[#allocation10_spill] sm:$0xff] }
 0x139   :  { %912 = vmatpush1.msra.mxu0 %v2974_v21  ;;  %983 = vmatpush1.msra.mxu1 %v3227_v58  ;;  %v4684_v21 = vld [vmem:[#allocation21_spill] sm:$0xff] }
 0x13a   :  { %913 = vmatprep.subr.mxu0 %v2983_v23  ;;  %984 = vmatprep.subr.mxu1 %v3234_v59  ;;  %v4685_v23 = vld [vmem:[#allocation11_spill] sm:$0xff]  ;;  %v4697_v58 = vld [vmem:[#allocation41_spill] sm:$0xff] }
 0x13b   :  { %914 = vmatpush1.msra.mxu0 %v2991_v24  ;;  %985 = vmatpush1.msra.mxu1 %v3241_v60  ;;  %v4686_v24 = vld [vmem:[#allocation22_spill] sm:$0xff]  ;;  %v160_v59 = vadd.f32 %v4697_v58, %v3470_v42  ;;  %4722 = vst [vmem:[#allocation41_spill] sm:$0xff] %v3941_v44 }
 0x13c   :  { %915 = vmatprep.subr.mxu0 %v3003_v26  ;;  %986 = vmatprep.subr.mxu1 %v3248_v61  ;;  %v4687_v26 = vld [vmem:[#allocation12_spill] sm:$0xff]  ;;  %v3780_v58 = vld [vmem:[%s4534_s2 + $0xf0] sm:$0xff] }
 0x13d   :  { %916 = vmatpush1.msra.mxu0 %v3009_v27  ;;  %987 = vmatpush1.msra.mxu1 %v3255_v62  ;;  %v4688_v27 = vld [vmem:[#allocation23_spill] sm:$0xff] }
 0x13e   :  { %917 = vmatprep.subr.mxu0 %v3016_v28  ;;  %988 = vmatprep.subr.mxu1 %v3262_v63  ;;  %v4689_v28 = vld [vmem:[#allocation13_spill] sm:$0xff] }
 0x13f   :  { %918 = vmatpush1.msra.mxu0 %v3025_v29  ;;  %989 = vmatpush1.msra.mxu1 %v3270_v0  ;;  %v4690_v29 = vld [vmem:[#allocation24_spill] sm:$0xff] }
 0x140   :  { %919 = vmatprep.subr.mxu0 %v4672_v5  ;;  %990 = vmatprep.subr.mxu1 %v3277_v1 }
 0x141   :  { %920 = vmatpush1.msra.mxu0 %v4673_v6  ;;  %991 = vmatpush1.msra.mxu1 %v3284_v3  ;;  %v4698_v3 = vld [vmem:[#allocation26_spill] sm:$0xff] }
 0x142   :  { %921 = vmatprep.subr.mxu0 %v3050_v33  ;;  %992 = vmatprep.subr.mxu1 %v4674_v7  ;;  %v4691_v33 = vld [vmem:[#allocation14_spill] sm:$0xff]  ;;  %v3645_v7 = vld [vmem:[%s4534_s2 + $0x188] sm:$0xff]  ;;  %4723 = vst [vmem:[#allocation26_spill] sm:$0xff] %v3946_v54 }
 0x143   :  { %922 = vmatpush1.msra.mxu0 %v4675_v9  ;;  %993 = vmatpush1.msra.mxu1 %v4676_v10  ;;  %v3650_v9 = vld [vmem:[%s4534_s2 + $0x198] sm:$0xff]  ;;  %v3657_v10 = vld [vmem:[%s4534_s2 + $0x180] sm:$0xff] }
 0x144   :  { %923 = vmatprep.subr.mxu0 %v4677_v11  ;;  %994 = vmatprep.subr.mxu1 %v4678_v12  ;;  %v3662_v11 = vld [vmem:[%s4534_s2 + $0x190] sm:$0xff]  ;;  %v3669_v12 = vld [vmem:[%s4534_s2 + $0x168] sm:$0xff] }
 0x145   :  { %924 = vmatpush1.msra.mxu0 %v4679_v14  ;;  %995 = vmatpush1.msra.mxu1 %v4680_v15  ;;  %v3674_v14 = vld [vmem:[%s4534_s2 + $0x178] sm:$0xff]  ;;  %v3681_v15 = vld [vmem:[%s4534_s2 + $0x160] sm:$0xff] }
 0x146   :  { %925 = vmatprep.subr.mxu0 %v4681_v16  ;;  %996 = vmatprep.subr.mxu1 %v4682_v17  ;;  %v3686_v16 = vld [vmem:[%s4534_s2 + $0x170] sm:$0xff]  ;;  %v3693_v17 = vld [vmem:[%s4534_s2 + $0x148] sm:$0xff] }
 0x147   :  { %926 = vmatpush1.msra.mxu0 %v4683_v19  ;;  %997 = vmatpush1.msra.mxu1 %v4684_v21  ;;  %v3698_v19 = vld [vmem:[%s4534_s2 + $0x158] sm:$0xff]  ;;  %v3705_v21 = vld [vmem:[%s4534_s2 + $0x140] sm:$0xff] }
 0x148   :  { %927 = vmatprep.subr.mxu0 %v4685_v23  ;;  %998 = vmatprep.subr.mxu1 %v4686_v24  ;;  %v3710_v23 = vld [vmem:[%s4534_s2 + $0x150] sm:$0xff]  ;;  %v3717_v24 = vld [vmem:[%s4534_s2 + $0x128] sm:$0xff] }
 0x149   :  { %928 = vmatpush1.msra.mxu0 %v4687_v26  ;;  %999 = vmatpush1.msra.mxu1 %v4688_v27  ;;  %v3722_v26 = vld [vmem:[%s4534_s2 + $0x138] sm:$0xff]  ;;  %v3729_v27 = vld [vmem:[%s4534_s2 + $0x120] sm:$0xff] }
 0x14a   :  { %929 = vmatprep.subr.mxu0 %v4689_v28  ;;  %1000 = vmatprep.subr.mxu1 %v4690_v29  ;;  %v3734_v28 = vld [vmem:[%s4534_s2 + $0x130] sm:$0xff]  ;;  %v3741_v29 = vld [vmem:[%s4534_s2 + $0x108] sm:$0xff] }
 0x14b   :  { %930 = vmatpush1.msra.mxu0 %v4691_v33  ;;  %963 = vmatprep.mubr.f32.mxu0 %v4692_v51  ;;  %v3746_v33 = vld [vmem:[%s4534_s2 + $0x118] sm:$0xff] }
 0x14c   :  { %1001 = vmatpush1.msra.mxu1 %v4693_v52  ;;  %1034 = vmatprep.mubr.f32.mxu1 %v4692_v51  ;;  %v3751_v52 = vld [vmem:[%s4534_s2 + $0x100] sm:$0xff] }
 0x14d   :  { %1213 = vmatprep.subr.mxu1 %v4694_v53  ;;  %v3758_v53 = vld [vmem:[%s4534_s2 + $0x110] sm:$0xff] }
 0x1ec   :  { %v722_v57 = vpop.f32.mrf.mxu0  ;;  %v793_v1 = vpop.f32.mrf.mxu1 }
 0x1ed   :  { %v798_v60 = vadd.f32 %v722_v57, %v158_v56  ;;  %v800_v8 = vadd.f32 %v793_v1, %v4698_v3  ;;  %v3768_v56 = vld [vmem:[%s4534_s2 + $0xf8] sm:$0xff]  ;;  %v3775_v57 = vld [vmem:[%s4534_s2 + $0xe0] sm:$0xff]  ;;  %v3826_v3 = vld [vmem:[%s4534_s2 + $0xb0] sm:$0xff] }
 0x1ee   :  { %v724_v61 = vpop.f32.mrf.mxu0  ;;  %v795_v4 = vpop.f32.mrf.mxu1  ;;  %v3821_v1 = vld [vmem:[%s4534_s2 + $0xa0] sm:$0xff]  ;;  %4705 = vst [vmem:[#allocation18_spill] sm:$0xff] %v3826_v3 }
 0x1ef   :  { %v2537_v62 = vmul.f32 -1.442695, %v798_v60  ;;  %v799_v63 = vadd.f32 %v724_v61, %v160_v59  ;;  %v2539_v34 = vmul.f32 -1.442695, %v800_v8  ;;  %v801_v36 = vadd.f32 %v795_v4, %v4699_v35  ;;  %v3785_v59 = vld [vmem:[%s4534_s2 + $0xc8] sm:$0xff]  ;;  %v3792_v60 = vld [vmem:[%s4534_s2 + $0xd8] sm:$0xff] }
 0x1f0   :  { %4702 = vst [vmem:[#allocation6_spill] sm:$0xff] %v3792_v60  ;;  %v3797_v61 = vld [vmem:[%s4534_s2 + $0xc0] sm:$0xff]  ;;  %v3833_v8 = vld [vmem:[%s4534_s2 + $0x88] sm:$0xff]  ;;  %v3838_v4 = vld [vmem:[%s4534_s2 + $0x98] sm:$0xff] }
 0x1f1   :  { %2652 = vpow2.f32 %v2537_v62  ;;  %v2538_v0 = vmul.f32 -1.442695, %v799_v63  ;;  %v3802_v62 = vld [vmem:[%s4534_s2 + $0xd0] sm:$0xff]  ;;  %v3809_v63 = vld [vmem:[%s4534_s2 + $0xa8] sm:$0xff]  ;;  %4706 = vst [vmem:[#allocation8_spill] sm:$0xff] %v3838_v4 }
 0x1f2   :  { %4703 = vst [vmem:[#allocation17_spill] sm:$0xff] %v3802_v62  ;;  %v3850_v35 = vld [vmem:[%s4534_s2 + $0x90] sm:$0xff] }
 0x1f3   :  { %2654 = vpow2.f32 %v2538_v0  ;;  %v3814_v0 = vld [vmem:[%s4534_s2 + $0xb8] sm:$0xff]  ;;  %4707 = vst [vmem:[#allocation19_spill] sm:$0xff] %v3850_v35 }
 0x1f4   :  { %2656 = vpow2.f32 %v2539_v34  ;;  %4704 = vst [vmem:[#allocation7_spill] sm:$0xff] %v3814_v0  ;;  %v3845_v34 = vld [vmem:[%s4534_s2 + $0x80] sm:$0xff] }
 0x1f5   :  { %2658 = vtanh.f32 %v801_v36  ;;  %v3857_v36 = vld [vmem:[%s4534_s2 + $0x68] sm:$0xff] }
 0x1f6   :  { %4708 = vst [vmem:[#allocation9_spill] sm:$0xff] %v3857_v36 }
 0x1fe   :  { %v2653_v13 = vpop.eup %2652 }
 0x1ff   :  { %v811_v37 = vadd.f32 1.0, %v2653_v13  ;;  %v3862_v13 = vld [vmem:[%s4534_s2 + $0x78] sm:$0xff] }
 0x200   :  { %v2655_v22 = vpop.eup %2654  ;;  %4709 = vst [vmem:[#allocation20_spill] sm:$0xff] %v3862_v13 }
 0x201   :  { %2660 = vrcp.f32 %v811_v37  ;;  %v812_v25 = vadd.f32 1.0, %v2655_v22  ;;  %v2657_v45 = vpop.eup %2656  ;;  %v3869_v37 = vld [vmem:[%s4534_s2 + $0x60] sm:$0xff]  ;;  %v3874_v22 = vld [vmem:[%s4534_s2 + $0x70] sm:$0xff] }
 0x202   :  { %v2659_v20 = vpop.eup %2658  ;;  %v813_v18 = vadd.f32 1.0, %v2657_v45  ;;  %4710 = vst [vmem:[#allocation10_spill] sm:$0xff] %v3869_v37  ;;  %4711 = vst [vmem:[#allocation21_spill] sm:$0xff] %v3874_v22  ;;  %v3886_v45 = vld [vmem:[%s4534_s2 + $0x58] sm:$0xff] }
 0x203   :  { %2662 = vrcp.f32 %v812_v25  ;;  %v3881_v25 = vld [vmem:[%s4534_s2 + $0x48] sm:$0xff]  ;;  %4713 = vst [vmem:[#allocation22_spill] sm:$0xff] %v3886_v45 }
 0x204   :  { %2664 = vrcp.f32 %v813_v18  ;;  %4712 = vst [vmem:[#allocation11_spill] sm:$0xff] %v3881_v25  ;;  %v3917_v18 = vld [vmem:[%s4534_s2 + $0x20] sm:$0xff] }
 0x205   :  { %4718 = vst [vmem:[#allocation14_spill] sm:$0xff] %v3917_v18 }
 0x20e   :  { %v2661_v38 = vpop.eup %2660 }
 0x20f   :  { %v822_v31 = vmul.f32 %v2661_v38, %v2659_v20  ;;  %v3893_v20 = vld [vmem:[%s4534_s2 + $0x40] sm:$0xff]  ;;  %v3898_v38 = vld [vmem:[%s4534_s2 + $0x50] sm:$0xff] }
 0x210   :  { %v2663_v43 = vpop.eup %2662  ;;  %4714 = vst [vmem:[#allocation12_spill] sm:$0xff] %v3893_v20  ;;  %4715 = vst [vmem:[#allocation23_spill] sm:$0xff] %v3898_v38 }
 0x211   :  { %v821_v39 = vmul.f32 %v2663_v43, %v3511_v41  ;;  %v2665_v32 = vpop.eup %2664  ;;  %v3609_v41 = vld [vmem:[%s4534_s2 + $0x1e8] sm:$0xff]  ;;  %v3910_v43 = vld [vmem:[%s4534_s2 + $0x38] sm:$0xff] }
 0x212   :  { %4701 = vst [vmem:[#allocation16_spill] sm:$0xff] %v3609_v41  ;;  %1142 = vmatprep.subr.mxu0 %v3609_v41  ;;  %4717 = vst [vmem:[#allocation24_spill] sm:$0xff] %v3910_v43 }
 0x213   :  { %v3592_v30 = vadd.f32 %v822_v31, %v821_v39  ;;  %v3905_v31 = vld [vmem:[%s4534_s2 + $0x28] sm:$0xff]  ;;  %v3922_v39 = vld [vmem:[%s4534_s2 + $0x30] sm:$0xff] }
 0x214   :  { %4716 = vst [vmem:[#allocation13_spill] sm:$0xff] %v3905_v31  ;;  %4719 = vst [vmem:[#allocation25_spill] sm:$0xff] %v3922_v39 }
 0x215   :  { %2666 = vtanh.f32 %v3592_v30 }
 0x222   :  { %v2667_v5 = vpop.eup %2666 }
 0x223   :  { %v3595_v6 = vmul.f32 %v2667_v5, %v2665_v32  ;;  %v3929_v32 = vld [vmem:[%s4534_s2 + $0x8] sm:$0xff]  ;;  %v3934_v5 = vld [vmem:[%s4534_s2 + $0x18] sm:$0xff] }
 0x224   :  { %4720 = vst [vmem:[#allocation15_spill] sm:$0xff] %v3929_v32  ;;  %4721 = vst [vmem:[#allocation38_spill] sm:$0xff] %v3934_v5 }
 0x225   :  { %4700 = vst [vmem:[#allocation5_spill] sm:$0xff] %v3595_v6  ;;  %964 = vmatmul.mubr.f32.vlgmr.msra.gmra.mxu0 %v3595_v6  ;;  %1035 = vmatmul.mubr.f32.vlgmr.msra.gmra.mxu1 %v3595_v6 }
 0x226   :  { %1214 = vmatpush1.msra.mxu1 %v3141_v46  ;;  %1206 = vmatprep.mubr.f32.mxu0 %v4692_v51  ;;  %v3615_v46 = vld [vmem:[%s4534_s2 + $0x1e0] sm:$0xff] }
 0x227   :  { %1215 = vmatprep.subr.mxu1 %v3148_v47  ;;  %1277 = vmatprep.mubr.f32.mxu1 %v4692_v51  ;;  %v3621_v47 = vld [vmem:[%s4534_s2 + $0x1c8] sm:$0xff] }
 0x228   :  { %1216 = vmatpush1.msra.mxu1 %v3156_v48  ;;  %1143 = vmatpush1.msra.mxu0 %v3615_v46  ;;  %v3627_v48 = vld [vmem:[%s4534_s2 + $0x1c0] sm:$0xff] }
 0x229   :  { %1217 = vmatprep.subr.mxu1 %v3162_v49  ;;  %1144 = vmatprep.subr.mxu0 %v3621_v47  ;;  %v3633_v49 = vld [vmem:[%s4534_s2 + $0x1a8] sm:$0xff] }
 0x22a   :  { %1218 = vmatpush1.msra.mxu1 %v3169_v50  ;;  %1145 = vmatpush1.msra.mxu0 %v3627_v48  ;;  %v3639_v50 = vld [vmem:[%s4534_s2 + $0x1a0] sm:$0xff] }
 0x22b   :  { %1146 = vmatprep.subr.mxu0 %v3633_v49  ;;  %1219 = vmatprep.subr.mxu1 %v3650_v9 }
 0x22c   :  { %1147 = vmatpush1.msra.mxu0 %v3639_v50  ;;  %1220 = vmatpush1.msra.mxu1 %v3662_v11 }
 0x22d   :  { %1148 = vmatprep.subr.mxu0 %v3645_v7  ;;  %1221 = vmatprep.subr.mxu1 %v3674_v14 }
 0x22e   :  { %1149 = vmatpush1.msra.mxu0 %v3657_v10  ;;  %1222 = vmatpush1.msra.mxu1 %v3686_v16 }
 0x22f   :  { %1150 = vmatprep.subr.mxu0 %v3669_v12  ;;  %1223 = vmatprep.subr.mxu1 %v3698_v19 }
 0x230   :  { %1151 = vmatpush1.msra.mxu0 %v3681_v15  ;;  %1224 = vmatpush1.msra.mxu1 %v3710_v23 }
 0x231   :  { %1152 = vmatprep.subr.mxu0 %v3693_v17  ;;  %1225 = vmatprep.subr.mxu1 %v3722_v26 }
 0x232   :  { %1153 = vmatpush1.msra.mxu0 %v3705_v21  ;;  %1226 = vmatpush1.msra.mxu1 %v3734_v28 }
 0x233   :  { %1154 = vmatprep.subr.mxu0 %v3717_v24  ;;  %1227 = vmatprep.subr.mxu1 %v3746_v33 }
 0x234   :  { %1155 = vmatpush1.msra.mxu0 %v3729_v27  ;;  %1228 = vmatpush1.msra.mxu1 %v3758_v53 }
 0x235   :  { %1156 = vmatprep.subr.mxu0 %v3741_v29  ;;  %1229 = vmatprep.subr.mxu1 %v3768_v56 }
 0x236   :  { %1157 = vmatpush1.msra.mxu0 %v3751_v52  ;;  %1230 = vmatpush1.msra.mxu1 %v3780_v58 }
 0x237   :  { %1158 = vmatprep.subr.mxu0 %v3763_v55  ;;  %1231 = vmatprep.subr.mxu1 %v3792_v60 }
 0x238   :  { %1159 = vmatpush1.msra.mxu0 %v3775_v57  ;;  %1232 = vmatpush1.msra.mxu1 %v3802_v62 }
 0x239   :  { %1160 = vmatprep.subr.mxu0 %v3785_v59  ;;  %1233 = vmatprep.subr.mxu1 %v3814_v0 }
 0x23a   :  { %1161 = vmatpush1.msra.mxu0 %v3797_v61  ;;  %1234 = vmatpush1.msra.mxu1 %v3826_v3  ;;  %v4726_v3 = vld [vmem:[#allocation29_spill] sm:$0xff] }
 0x23b   :  { %1162 = vmatprep.subr.mxu0 %v3809_v63  ;;  %1235 = vmatprep.subr.mxu1 %v3838_v4 }
 0x23c   :  { %1163 = vmatpush1.msra.mxu0 %v3821_v1  ;;  %1236 = vmatpush1.msra.mxu1 %v3850_v35 }
 0x23d   :  { %1164 = vmatprep.subr.mxu0 %v3833_v8  ;;  %1237 = vmatprep.subr.mxu1 %v3862_v13  ;;  %v4725_v13 = vld [vmem:[#allocation28_spill] sm:$0xff] }
 0x23e   :  { %1165 = vmatpush1.msra.mxu0 %v3845_v34  ;;  %1238 = vmatpush1.msra.mxu1 %v3874_v22 }
 0x23f   :  { %1166 = vmatprep.subr.mxu0 %v3857_v36  ;;  %1239 = vmatprep.subr.mxu1 %v3886_v45 }
 0x240   :  { %1167 = vmatpush1.msra.mxu0 %v3869_v37  ;;  %1240 = vmatpush1.msra.mxu1 %v3898_v38  ;;  %v4724_v38 = vld [vmem:[#allocation43_spill] sm:$0xff] }
 0x241   :  { %1168 = vmatprep.subr.mxu0 %v3881_v25  ;;  %1241 = vmatprep.subr.mxu1 %v3910_v43 }
 0x242   :  { %1169 = vmatpush1.msra.mxu0 %v3893_v20  ;;  %1242 = vmatpush1.msra.mxu1 %v3922_v39 }
 0x243   :  { %1170 = vmatprep.subr.mxu0 %v3905_v31  ;;  %1243 = vmatprep.subr.mxu1 %v3934_v5 }
 0x244   :  { %1171 = vmatpush1.msra.mxu0 %v3917_v18  ;;  %1244 = vmatpush1.msra.mxu1 %v3946_v54 }
 0x245   :  { %1172 = vmatprep.subr.mxu0 %v3929_v32 }
 0x246   :  { %1173 = vmatpush1.msra.mxu0 %v3941_v44 }
 0x247   :  { %1385 = vmatprep.subr.mxu0 %v3609_v41 }
 0x2e5   :  { %v965_v42 = vpop.f32.mrf.mxu0  ;;  %v1036_v39 = vpop.f32.mrf.mxu1 }
 0x2e6   :  { %v1041_v6 = vadd.f32 %v965_v42, %v3475_v40  ;;  %v1043_v35 = vadd.f32 %v1036_v39, %v4725_v13  ;;  %v4034_v39 = vld [vmem:[%s4534_s2 + $0x1b0] sm:$0xff] }
 0x2e7   :  { %v967_v2 = vpop.f32.mrf.mxu0  ;;  %v1038_v5 = vpop.f32.mrf.mxu1 }
 0x2e8   :  { %v2540_v43 = vmul.f32 -1.442695, %v1041_v6  ;;  %v1042_v45 = vadd.f32 %v967_v2, %v4724_v38  ;;  %v2542_v4 = vmul.f32 -1.442695, %v1043_v35  ;;  %v1044_v0 = vadd.f32 %v1038_v5, %v4726_v3  ;;  %v4028_v35 = vld [vmem:[%s4534_s2 + $0x1b8] sm:$0xff]  ;;  %v4729_v5 = vld [vmem:[#allocation6_spill] sm:$0xff] }
 0x2ea   :  { %2668 = vpow2.f32 %v2540_v43  ;;  %v2541_v22 = vmul.f32 -1.442695, %v1042_v45 }
 0x2ec   :  { %2670 = vpow2.f32 %v2541_v22 }
 0x2ed   :  { %2672 = vpow2.f32 %v2542_v4 }
 0x2ee   :  { %2674 = vtanh.f32 %v1044_v0  ;;  %v4022_v0 = vld [vmem:[%s4534_s2 + $0x1d0] sm:$0xff] }
 0x2f7   :  { %v2669_v54 = vpop.eup %2668 }
 0x2f8   :  { %v1054_v62 = vadd.f32 1.0, %v2669_v54 }
 0x2f9   :  { %v2671_v60 = vpop.eup %2670 }
 0x2fa   :  { %2676 = vrcp.f32 %v1054_v62  ;;  %v1055_v42 = vadd.f32 1.0, %v2671_v60  ;;  %v2673_v40 = vpop.eup %2672  ;;  %v4010_v60 = vld [vmem:[%s4534_s2 + $0x1f0] sm:$0xff]  ;;  %v4016_v62 = vld [vmem:[%s4534_s2 + $0x1d8] sm:$0xff] }
 0x2fb   :  { %v2675_v2 = vpop.eup %2674  ;;  %v1056_v38 = vadd.f32 1.0, %v2673_v40  ;;  %v4731_v40 = vld [vmem:[#allocation7_spill] sm:$0xff] }
 0x2fc   :  { %2678 = vrcp.f32 %v1055_v42  ;;  %v4730_v42 = vld [vmem:[#allocation17_spill] sm:$0xff] }
 0x2fd   :  { %2680 = vrcp.f32 %v1056_v38  ;;  %v4736_v38 = vld [vmem:[#allocation21_spill] sm:$0xff] }
 0x307   :  { %v2677_v6 = vpop.eup %2676 }
 0x308   :  { %v1065_v45 = vmul.f32 %v2677_v6, %v2675_v2  ;;  %v4732_v2 = vld [vmem:[#allocation18_spill] sm:$0xff]  ;;  %v4733_v6 = vld [vmem:[#allocation8_spill] sm:$0xff] }
 0x309   :  { %v2679_v22 = vpop.eup %2678 }
 0x30a   :  { %v1064_v13 = vmul.f32 %v2679_v22, %v3592_v30  ;;  %v2681_v54 = vpop.eup %2680  ;;  %v4004_v30 = vld [vmem:[%s4534_s2 + $0x1f8] sm:$0xff]  ;;  %v4735_v22 = vld [vmem:[#allocation20_spill] sm:$0xff] }
 0x30b   :  { %4728 = vst [vmem:[#allocation43_spill] sm:$0xff] %v4004_v30  ;;  %1456 = vmatprep.subr.mxu1 %v4004_v30 }
 0x30c   :  { %v3960_v43 = vadd.f32 %v1065_v45, %v1064_v13  ;;  %v4734_v45 = vld [vmem:[#allocation19_spill] sm:$0xff]  ;;  %v4737_v13 = vld [vmem:[#allocation22_spill] sm:$0xff] }
 0x30e   :  { %2682 = vtanh.f32 %v3960_v43 }
 0x31b   :  { %v2683_v3 = vpop.eup %2682 }
 0x31c   :  { %v3963_v4 = vmul.f32 %v2683_v3, %v2681_v54  ;;  %v4738_v54 = vld [vmem:[#allocation23_spill] sm:$0xff]  ;;  %v4739_v3 = vld [vmem:[#allocation24_spill] sm:$0xff] }
 0x31e   :  { %4727 = vst [vmem:[#allocation27_spill] sm:$0xff] %v3963_v4  ;;  %1207 = vmatmul.mubr.f32.vlgmr.msra.gmra.mxu0 %v3963_v4  ;;  %1278 = vmatmul.mubr.f32.vlgmr.msra.gmra.mxu1 %v3963_v4  ;;  %v4740_v4 = vld [vmem:[#allocation25_spill] sm:$0xff] }
 0x31f   :  { %1386 = vmatpush1.msra.mxu0 %v3615_v46  ;;  %1449 = vmatprep.mubr.f32.mxu0 %v4692_v51 }
 0x320   :  { %1387 = vmatprep.subr.mxu0 %v3621_v47  ;;  %1520 = vmatprep.mubr.f32.mxu1 %v4692_v51  ;;  %v4742_v51 = vld [vmem:[#allocation26_spill] sm:$0xff] }
 0x321   :  { %1388 = vmatpush1.msra.mxu0 %v3627_v48  ;;  %1457 = vmatpush1.msra.mxu1 %v4010_v60 }
 0x322   :  { %1389 = vmatprep.subr.mxu0 %v3633_v49  ;;  %1458 = vmatprep.subr.mxu1 %v4016_v62 }
 0x323   :  { %1390 = vmatpush1.msra.mxu0 %v3639_v50  ;;  %1459 = vmatpush1.msra.mxu1 %v4022_v0 }
 0x324   :  { %1391 = vmatprep.subr.mxu0 %v3645_v7  ;;  %1460 = vmatprep.subr.mxu1 %v4028_v35 }
 0x325   :  { %1392 = vmatpush1.msra.mxu0 %v3657_v10  ;;  %1461 = vmatpush1.msra.mxu1 %v4034_v39 }
 0x326   :  { %1393 = vmatprep.subr.mxu0 %v3669_v12  ;;  %1462 = vmatprep.subr.mxu1 %v3650_v9 }
 0x327   :  { %1394 = vmatpush1.msra.mxu0 %v3681_v15  ;;  %1463 = vmatpush1.msra.mxu1 %v3662_v11 }
 0x328   :  { %1395 = vmatprep.subr.mxu0 %v3693_v17  ;;  %1464 = vmatprep.subr.mxu1 %v3674_v14 }
 0x329   :  { %1396 = vmatpush1.msra.mxu0 %v3705_v21  ;;  %1465 = vmatpush1.msra.mxu1 %v3686_v16 }
 0x32a   :  { %1397 = vmatprep.subr.mxu0 %v3717_v24  ;;  %1466 = vmatprep.subr.mxu1 %v3698_v19 }
 0x32b   :  { %1398 = vmatpush1.msra.mxu0 %v3729_v27  ;;  %1467 = vmatpush1.msra.mxu1 %v3710_v23 }
 0x32c   :  { %1399 = vmatprep.subr.mxu0 %v3741_v29  ;;  %1468 = vmatprep.subr.mxu1 %v3722_v26 }
 0x32d   :  { %1400 = vmatpush1.msra.mxu0 %v3751_v52  ;;  %1469 = vmatpush1.msra.mxu1 %v3734_v28 }
 0x32e   :  { %1401 = vmatprep.subr.mxu0 %v3763_v55  ;;  %1470 = vmatprep.subr.mxu1 %v3746_v33 }
 0x32f   :  { %1402 = vmatpush1.msra.mxu0 %v3775_v57  ;;  %1471 = vmatpush1.msra.mxu1 %v3758_v53 }
 0x330   :  { %1403 = vmatprep.subr.mxu0 %v3785_v59  ;;  %1472 = vmatprep.subr.mxu1 %v3768_v56 }
 0x331   :  { %1404 = vmatpush1.msra.mxu0 %v3797_v61  ;;  %1473 = vmatpush1.msra.mxu1 %v3780_v58 }
 0x332   :  { %1405 = vmatprep.subr.mxu0 %v3809_v63  ;;  %1474 = vmatprep.subr.mxu1 %v4729_v5 }
 0x333   :  { %1406 = vmatpush1.msra.mxu0 %v3821_v1  ;;  %1475 = vmatpush1.msra.mxu1 %v4730_v42 }
 0x334   :  { %1407 = vmatprep.subr.mxu0 %v3833_v8  ;;  %1476 = vmatprep.subr.mxu1 %v4731_v40 }
 0x335   :  { %1408 = vmatpush1.msra.mxu0 %v3845_v34  ;;  %1477 = vmatpush1.msra.mxu1 %v4732_v2 }
 0x336   :  { %1409 = vmatprep.subr.mxu0 %v3857_v36  ;;  %1478 = vmatprep.subr.mxu1 %v4733_v6 }
 0x337   :  { %1410 = vmatpush1.msra.mxu0 %v3869_v37  ;;  %1479 = vmatpush1.msra.mxu1 %v4734_v45 }
 0x338   :  { %1411 = vmatprep.subr.mxu0 %v3881_v25  ;;  %1480 = vmatprep.subr.mxu1 %v4735_v22  ;;  %v4744_v25 = vld [vmem:[#allocation45_spill] sm:$0xff] }
 0x339   :  { %1412 = vmatpush1.msra.mxu0 %v3893_v20  ;;  %1481 = vmatpush1.msra.mxu1 %v4736_v38 }
 0x33a   :  { %1413 = vmatprep.subr.mxu0 %v3905_v31  ;;  %1482 = vmatprep.subr.mxu1 %v4737_v13 }
 0x33b   :  { %1414 = vmatpush1.msra.mxu0 %v3917_v18  ;;  %1483 = vmatpush1.msra.mxu1 %v4738_v54 }
 0x33c   :  { %1415 = vmatprep.subr.mxu0 %v3929_v32  ;;  %1484 = vmatprep.subr.mxu1 %v4739_v3  ;;  %v4743_v32 = vld [vmem:[#allocation44_spill] sm:$0xff]  ;;  %v4745_v3 = vld [vmem:[#allocation30_spill] sm:$0xff] }
 0x33d   :  { %1416 = vmatpush1.msra.mxu0 %v3941_v44  ;;  %1485 = vmatpush1.msra.mxu1 %v4740_v4 }
 0x33e   :  { %1628 = vmatprep.subr.mxu0 %v3609_v41  ;;  %v4741_v41 = vld [vmem:[#allocation38_spill] sm:$0xff] }
 0x33f   :  { %1486 = vmatprep.subr.mxu1 %v4741_v41  ;;  %v4746_v41 = vld [vmem:[#allocation31_spill] sm:$0xff] }
 0x340   :  { %1487 = vmatpush1.msra.mxu1 %v4742_v51 }
 0x341   :  { %1699 = vmatprep.subr.mxu1 %v4004_v30 }
 0x3de   :  { %v1208_v44 = vpop.f32.mrf.mxu0  ;;  %v1279_v54 = vpop.f32.mrf.mxu1 }
 0x3df   :  { %v1284_v18 = vadd.f32 %v1208_v44, %v4743_v32  ;;  %v1286_v37 = vadd.f32 %v1279_v54, %v4745_v3  ;;  %v4754_v3 = vld [vmem:[#allocation22_spill] sm:$0xff] }
 0x3e0   :  { %v1210_v31 = vpop.f32.mrf.mxu0  ;;  %v1281_v4 = vpop.f32.mrf.mxu1 }
 0x3e1   :  { %v2543_v20 = vmul.f32 -1.442695, %v1284_v18  ;;  %v1285_v38 = vadd.f32 %v1210_v31, %v4744_v25  ;;  %v2545_v22 = vmul.f32 -1.442695, %v1286_v37  ;;  %v1287_v36 = vadd.f32 %v1281_v4, %v4746_v41  ;;  %v4750_v4 = vld [vmem:[#allocation20_spill] sm:$0xff] }
 0x3e3   :  { %2684 = vpow2.f32 %v2543_v20  ;;  %v2544_v13 = vmul.f32 -1.442695, %v1285_v38 }
 0x3e5   :  { %2686 = vpow2.f32 %v2544_v13 }
 0x3e6   :  { %2688 = vpow2.f32 %v2545_v22  ;;  %v4753_v22 = vld [vmem:[#allocation11_spill] sm:$0xff] }
 0x3e7   :  { %2690 = vtanh.f32 %v1287_v36  ;;  %v4748_v36 = vld [vmem:[#allocation19_spill] sm:$0xff] }
 0x3f0   :  { %v2685_v51 = vpop.eup %2684 }
 0x3f1   :  { %v1297_v45 = vadd.f32 1.0, %v2685_v51 }
 0x3f2   :  { %v2687_v30 = vpop.eup %2686 }
 0x3f3   :  { %2692 = vrcp.f32 %v1297_v45  ;;  %v1298_v44 = vadd.f32 1.0, %v2687_v30  ;;  %v2689_v18 = vpop.eup %2688  ;;  %v4751_v30 = vld [vmem:[#allocation10_spill] sm:$0xff]  ;;  %v4752_v45 = vld [vmem:[#allocation21_spill] sm:$0xff] }
 0x3f4   :  { %v2691_v25 = vpop.eup %2690  ;;  %v1299_v38 = vadd.f32 1.0, %v2689_v18  ;;  %v4756_v18 = vld [vmem:[#allocation23_spill] sm:$0xff] }
 0x3f5   :  { %2694 = vrcp.f32 %v1298_v44  ;;  %v4755_v44 = vld [vmem:[#allocation12_spill] sm:$0xff] }
 0x3f6   :  { %2696 = vrcp.f32 %v1299_v38  ;;  %v4761_v38 = vld [vmem:[#allocation15_spill] sm:$0xff] }
 0x400   :  { %v2693_v20 = vpop.eup %2692 }
 0x401   :  { %v1308_v31 = vmul.f32 %v2693_v20, %v2691_v25  ;;  %v4757_v25 = vld [vmem:[#allocation13_spill] sm:$0xff]  ;;  %v4758_v20 = vld [vmem:[#allocation24_spill] sm:$0xff] }
 0x402   :  { %v2695_v32 = vpop.eup %2694 }
 0x403   :  { %v1307_v13 = vmul.f32 %v2695_v32, %v3960_v43  ;;  %v2697_v51 = vpop.eup %2696  ;;  %v4749_v43 = vld [vmem:[#allocation9_spill] sm:$0xff] }
 0x404   :  { %v4760_v32 = vld [vmem:[#allocation25_spill] sm:$0xff] }
 0x405   :  { %v4069_v54 = vadd.f32 %v1308_v31, %v1307_v13  ;;  %v4759_v31 = vld [vmem:[#allocation14_spill] sm:$0xff] }
 0x406   :  { %v4762_v13 = vld [vmem:[#allocation38_spill] sm:$0xff] }
 0x407   :  { %2698 = vtanh.f32 %v4069_v54 }
 0x414   :  { %v2699_v41 = vpop.eup %2698 }
 0x415   :  { %v4072_v37 = vmul.f32 %v2699_v41, %v2697_v51  ;;  %v4763_v51 = vld [vmem:[#allocation41_spill] sm:$0xff]  ;;  %v4764_v41 = vmov 0.0  }
 0x417   :  { %4747 = vst [vmem:[#allocation28_spill] sm:$0xff] %v4072_v37  ;;  %1450 = vmatmul.mubr.f32.vlgmr.msra.gmra.mxu0 %v4072_v37  ;;  %1521 = vmatmul.mubr.f32.vlgmr.msra.gmra.mxu1 %v4072_v37  ;;  %v4765_v37 = vld [vmem:[#allocation26_spill] sm:$0xff] }
 0x418   :  { %1629 = vmatpush1.msra.mxu0 %v3615_v46  ;;  %1700 = vmatpush1.msra.mxu1 %v4010_v60 }
 0x419   :  { %1630 = vmatprep.subr.mxu0 %v3621_v47  ;;  %1701 = vmatprep.subr.mxu1 %v4016_v62 }
 0x41a   :  { %1631 = vmatpush1.msra.mxu0 %v3627_v48  ;;  %1702 = vmatpush1.msra.mxu1 %v4022_v0 }
 0x41b   :  { %1632 = vmatprep.subr.mxu0 %v3633_v49  ;;  %1703 = vmatprep.subr.mxu1 %v4028_v35 }
 0x41c   :  { %1633 = vmatpush1.msra.mxu0 %v3639_v50  ;;  %1704 = vmatpush1.msra.mxu1 %v4034_v39 }
 0x41d   :  { %1634 = vmatprep.subr.mxu0 %v3645_v7  ;;  %1705 = vmatprep.subr.mxu1 %v3650_v9 }
 0x41e   :  { %1635 = vmatpush1.msra.mxu0 %v3657_v10  ;;  %1706 = vmatpush1.msra.mxu1 %v3662_v11 }
 0x41f   :  { %1636 = vmatprep.subr.mxu0 %v3669_v12  ;;  %1707 = vmatprep.subr.mxu1 %v3674_v14 }
 0x420   :  { %1637 = vmatpush1.msra.mxu0 %v3681_v15  ;;  %1708 = vmatpush1.msra.mxu1 %v3686_v16 }
 0x421   :  { %1638 = vmatprep.subr.mxu0 %v3693_v17  ;;  %1709 = vmatprep.subr.mxu1 %v3698_v19 }
 0x422   :  { %1639 = vmatpush1.msra.mxu0 %v3705_v21  ;;  %1710 = vmatpush1.msra.mxu1 %v3710_v23 }
 0x423   :  { %1640 = vmatprep.subr.mxu0 %v3717_v24  ;;  %1711 = vmatprep.subr.mxu1 %v3722_v26 }
 0x424   :  { %1641 = vmatpush1.msra.mxu0 %v3729_v27  ;;  %1712 = vmatpush1.msra.mxu1 %v3734_v28 }
 0x425   :  { %1642 = vmatprep.subr.mxu0 %v3741_v29  ;;  %1713 = vmatprep.subr.mxu1 %v3746_v33 }
 0x426   :  { %1643 = vmatpush1.msra.mxu0 %v3751_v52  ;;  %1714 = vmatpush1.msra.mxu1 %v3758_v53 }
 0x427   :  { %1644 = vmatprep.subr.mxu0 %v3763_v55  ;;  %1715 = vmatprep.subr.mxu1 %v3768_v56 }
 0x428   :  { %1645 = vmatpush1.msra.mxu0 %v3775_v57  ;;  %1716 = vmatpush1.msra.mxu1 %v3780_v58 }
 0x429   :  { %1646 = vmatprep.subr.mxu0 %v3785_v59  ;;  %1717 = vmatprep.subr.mxu1 %v4729_v5 }
 0x42a   :  { %1647 = vmatpush1.msra.mxu0 %v3797_v61  ;;  %1718 = vmatpush1.msra.mxu1 %v4730_v42 }
 0x42b   :  { %1648 = vmatprep.subr.mxu0 %v3809_v63  ;;  %1719 = vmatprep.subr.mxu1 %v4731_v40 }
 0x42c   :  { %1649 = vmatpush1.msra.mxu0 %v3821_v1  ;;  %1720 = vmatpush1.msra.mxu1 %v4732_v2 }
 0x42d   :  { %1650 = vmatprep.subr.mxu0 %v3833_v8  ;;  %1721 = vmatprep.subr.mxu1 %v4733_v6 }
 0x42e   :  { %1651 = vmatpush1.msra.mxu0 %v3845_v34  ;;  %1722 = vmatpush1.msra.mxu1 %v4748_v36 }
 0x42f   :  { %1652 = vmatprep.subr.mxu0 %v4749_v43  ;;  %1723 = vmatprep.subr.mxu1 %v4750_v4 }
 0x430   :  { %1653 = vmatpush1.msra.mxu0 %v4751_v30  ;;  %1724 = vmatpush1.msra.mxu1 %v4752_v45  ;;  %v4770_v45 = vld [vmem:[#allocation32_spill] sm:$0xff] }
 0x431   :  { %1654 = vmatprep.subr.mxu0 %v4753_v22  ;;  %1725 = vmatprep.subr.mxu1 %v4754_v3 }
 0x432   :  { %1655 = vmatpush1.msra.mxu0 %v4755_v44  ;;  %1726 = vmatpush1.msra.mxu1 %v4756_v18  ;;  %v4766_v18 = vld [vmem:[#allocation16_spill] sm:$0xff] }
 0x433   :  { %1656 = vmatprep.subr.mxu0 %v4757_v25  ;;  %1727 = vmatprep.subr.mxu1 %v4758_v20  ;;  %v4767_v25 = vld [vmem:[#allocation43_spill] sm:$0xff] }
 0x434   :  { %1657 = vmatpush1.msra.mxu0 %v4759_v31  ;;  %1728 = vmatpush1.msra.mxu1 %v4760_v32  ;;  %v4768_v31 = vld [vmem:[#allocation46_spill] sm:$0xff] }
 0x435   :  { %1658 = vmatprep.subr.mxu0 %v4761_v38  ;;  %1729 = vmatprep.subr.mxu1 %v4762_v13  ;;  %v4769_v38 = vld [vmem:[#allocation47_spill] sm:$0xff] }
 0x436   :  { %1659 = vmatpush1.msra.mxu0 %v4763_v51  ;;  %1692 = vmatprep.mubr.f32.mxu0 %v4764_v41 }
 0x437   :  { %1730 = vmatpush1.msra.mxu1 %v4765_v37  ;;  %1763 = vmatprep.mubr.f32.mxu1 %v4764_v41  ;;  %v4771_v41 = vld [vmem:[#allocation33_spill] sm:$0xff] }
 0x438   :  { %1871 = vmatprep.subr.mxu0 %v4766_v18  ;;  %1942 = vmatprep.subr.mxu1 %v4767_v25 }
 0x4d7   :  { %v1451_v20 = vpop.f32.mrf.mxu0  ;;  %v1522_v51 = vpop.f32.mrf.mxu1 }
 0x4d8   :  { %v1527_v44 = vadd.f32 %v1451_v20, %v4768_v31  ;;  %v1529_v30 = vadd.f32 %v1522_v51, %v4770_v45 }
 0x4d9   :  { %v1453_v32 = vpop.f32.mrf.mxu0  ;;  %v1524_v37 = vpop.f32.mrf.mxu1 }
 0x4da   :  { %v2546_v3 = vmul.f32 -1.442695, %v1527_v44  ;;  %v1528_v22 = vadd.f32 %v1453_v32, %v4769_v38  ;;  %v2548_v4 = vmul.f32 -1.442695, %v1529_v30  ;;  %v1530_v43 = vadd.f32 %v1524_v37, %v4771_v41 }
 0x4dc   :  { %2700 = vpow2.f32 %v2546_v3  ;;  %v2547_v13 = vmul.f32 -1.442695, %v1528_v22 }
 0x4de   :  { %2702 = vpow2.f32 %v2547_v13 }
 0x4df   :  { %2704 = vpow2.f32 %v2548_v4 }
 0x4e0   :  { %2706 = vtanh.f32 %v1530_v43 }
 0x4e9   :  { %v2701_v18 = vpop.eup %2700 }
 0x4ea   :  { %v1540_v36 = vadd.f32 1.0, %v2701_v18 }
 0x4eb   :  { %v2703_v25 = vpop.eup %2702 }
 0x4ec   :  { %2708 = vrcp.f32 %v1540_v36  ;;  %v1541_v20 = vadd.f32 1.0, %v2703_v25  ;;  %v2705_v44 = vpop.eup %2704 }
 0x4ed   :  { %v2707_v31 = vpop.eup %2706  ;;  %v1542_v38 = vadd.f32 1.0, %v2705_v44 }
 0x4ee   :  { %2710 = vrcp.f32 %v1541_v20 }
 0x4ef   :  { %2712 = vrcp.f32 %v1542_v38  ;;  %v2095_v38 = vld [vmem:[%s4534_s2 + $0x168] sm:$0xff] }
 0x4f9   :  { %v2709_v3 = vpop.eup %2708 }
 0x4fa   :  { %v1551_v22 = vmul.f32 %v2709_v3, %v2707_v31  ;;  %v2111_v31 = vld [vmem:[%s4534_s2 + $0x1e8] sm:$0xff] }
 0x4fb   :  { %v2711_v32 = vpop.eup %2710  ;;  %v2099_v3 = vld [vmem:[%s4534_s2 + $0x188] sm:$0xff] }
 0x4fc   :  { %v1550_v45 = vmul.f32 %v2711_v32, %v4069_v54  ;;  %v2713_v37 = vpop.eup %2712  ;;  %v2101_v32 = vld [vmem:[%s4534_s2 + $0x198] sm:$0xff] }
 0x4fe   :  { %v4147_v13 = vadd.f32 %v1551_v22, %v1550_v45  ;;  %v2098_v22 = vld [vmem:[%s4534_s2 + $0x180] sm:$0xff]  ;;  %v2100_v45 = vld [vmem:[%s4534_s2 + $0x190] sm:$0xff] }
 0x500   :  { %2714 = vtanh.f32 %v4147_v13 }
 0x50d   :  { %v2715_v4 = vpop.eup %2714 }
 0x50e   :  { %v4150_v30 = vmul.f32 %v2715_v4, %v2713_v37  ;;  %v2097_v37 = vld [vmem:[%s4534_s2 + $0x178] sm:$0xff]  ;;  %v2091_v4 = vld [vmem:[%s4534_s2 + $0x148] sm:$0xff] }
 0x510   :  { %1693 = vmatmul.mubr.f32.vlgmr.msra.gmra.mxu0 %v4150_v30  ;;  %1764 = vmatmul.mubr.f32.vlgmr.msra.gmra.mxu1 %v4150_v30 }
 0x511   :  { %1872 = vmatpush1.msra.mxu0 %v3615_v46  ;;  %1943 = vmatpush1.msra.mxu1 %v4010_v60  ;;  %v4772_v46 = vld [vmem:[#allocation19_spill] sm:$0xff] }
 0x512   :  { %1873 = vmatprep.subr.mxu0 %v3621_v47  ;;  %1944 = vmatprep.subr.mxu1 %v4016_v62  ;;  %v4773_v47 = vld [vmem:[#allocation9_spill] sm:$0xff] }
 0x513   :  { %1874 = vmatpush1.msra.mxu0 %v3627_v48  ;;  %1945 = vmatpush1.msra.mxu1 %v4022_v0  ;;  %v4774_v48 = vld [vmem:[#allocation20_spill] sm:$0xff] }
 0x514   :  { %1875 = vmatprep.subr.mxu0 %v3633_v49  ;;  %1946 = vmatprep.subr.mxu1 %v4028_v35  ;;  %v4775_v49 = vld [vmem:[#allocation10_spill] sm:$0xff] }
 0x515   :  { %1876 = vmatpush1.msra.mxu0 %v3639_v50  ;;  %1947 = vmatpush1.msra.mxu1 %v4034_v39  ;;  %v4776_v50 = vld [vmem:[#allocation21_spill] sm:$0xff] }
 0x516   :  { %1877 = vmatprep.subr.mxu0 %v3645_v7  ;;  %1948 = vmatprep.subr.mxu1 %v3650_v9  ;;  %v4777_v7 = vld [vmem:[#allocation11_spill] sm:$0xff]  ;;  %v4778_v9 = vld [vmem:[#allocation22_spill] sm:$0xff] }
 0x517   :  { %1878 = vmatpush1.msra.mxu0 %v3657_v10  ;;  %1949 = vmatpush1.msra.mxu1 %v3662_v11  ;;  %v4779_v10 = vld [vmem:[#allocation12_spill] sm:$0xff]  ;;  %v4780_v11 = vld [vmem:[#allocation23_spill] sm:$0xff] }
 0x518   :  { %1879 = vmatprep.subr.mxu0 %v3669_v12  ;;  %1950 = vmatprep.subr.mxu1 %v3674_v14  ;;  %v4781_v12 = vld [vmem:[#allocation13_spill] sm:$0xff]  ;;  %v4782_v14 = vld [vmem:[#allocation24_spill] sm:$0xff] }
 0x519   :  { %1880 = vmatpush1.msra.mxu0 %v3681_v15  ;;  %1951 = vmatpush1.msra.mxu1 %v3686_v16  ;;  %v4783_v15 = vld [vmem:[#allocation14_spill] sm:$0xff]  ;;  %v4784_v16 = vld [vmem:[#allocation25_spill] sm:$0xff] }
 0x51a   :  { %1881 = vmatprep.subr.mxu0 %v3693_v17  ;;  %1952 = vmatprep.subr.mxu1 %v3698_v19  ;;  %v4785_v17 = vld [vmem:[#allocation15_spill] sm:$0xff]  ;;  %v4786_v19 = vld [vmem:[#allocation38_spill] sm:$0xff] }
 0x51b   :  { %1882 = vmatpush1.msra.mxu0 %v3705_v21  ;;  %1953 = vmatpush1.msra.mxu1 %v3710_v23  ;;  %v4787_v21 = vld [vmem:[#allocation41_spill] sm:$0xff]  ;;  %v4788_v23 = vmov 0.0  }
 0x51c   :  { %1883 = vmatprep.subr.mxu0 %v3717_v24  ;;  %1954 = vmatprep.subr.mxu1 %v3722_v26  ;;  %v4789_v24 = vld [vmem:[#allocation26_spill] sm:$0xff]  ;;  %v4790_v26 = vld [vmem:[#allocation43_spill] sm:$0xff] }
 0x51d   :  { %1884 = vmatpush1.msra.mxu0 %v3729_v27  ;;  %1955 = vmatpush1.msra.mxu1 %v3734_v28  ;;  %v4791_v28 = vld [vmem:[#allocation48_spill] sm:$0xff] }
 0x51e   :  { %1885 = vmatprep.subr.mxu0 %v3741_v29  ;;  %1956 = vmatprep.subr.mxu1 %v3746_v33 }
 0x51f   :  { %1886 = vmatpush1.msra.mxu0 %v3751_v52  ;;  %1957 = vmatpush1.msra.mxu1 %v3758_v53  ;;  %v4792_v53 = vld [vmem:[#allocation49_spill] sm:$0xff] }
 0x520   :  { %1887 = vmatprep.subr.mxu0 %v3763_v55  ;;  %1958 = vmatprep.subr.mxu1 %v3768_v56 }
 0x521   :  { %1888 = vmatpush1.msra.mxu0 %v3775_v57  ;;  %1959 = vmatpush1.msra.mxu1 %v3780_v58  ;;  %v4793_v58 = vld [vmem:[#allocation34_spill] sm:$0xff] }
 0x522   :  { %1889 = vmatprep.subr.mxu0 %v3785_v59  ;;  %1960 = vmatprep.subr.mxu1 %v4729_v5 }
 0x523   :  { %1890 = vmatpush1.msra.mxu0 %v3797_v61  ;;  %1961 = vmatpush1.msra.mxu1 %v4730_v42 }
 0x524   :  { %1891 = vmatprep.subr.mxu0 %v3809_v63  ;;  %1962 = vmatprep.subr.mxu1 %v4731_v40 }
 0x525   :  { %1892 = vmatpush1.msra.mxu0 %v3821_v1  ;;  %1963 = vmatpush1.msra.mxu1 %v4732_v2  ;;  %v4794_v1 = vld [vmem:[#allocation35_spill] sm:$0xff] }
 0x526   :  { %1893 = vmatprep.subr.mxu0 %v3833_v8  ;;  %1964 = vmatprep.subr.mxu1 %v4733_v6 }
 0x527   :  { %1894 = vmatpush1.msra.mxu0 %v3845_v34  ;;  %1965 = vmatpush1.msra.mxu1 %v4772_v46  ;;  %v2096_v46 = vld [vmem:[%s4534_s2 + $0x170] sm:$0xff] }
 0x528   :  { %1895 = vmatprep.subr.mxu0 %v4773_v47  ;;  %1966 = vmatprep.subr.mxu1 %v4774_v48  ;;  %v2090_v47 = vld [vmem:[%s4534_s2 + $0x140] sm:$0xff]  ;;  %v2093_v48 = vld [vmem:[%s4534_s2 + $0x158] sm:$0xff] }
 0x529   :  { %1896 = vmatpush1.msra.mxu0 %v4775_v49  ;;  %1967 = vmatpush1.msra.mxu1 %v4776_v50  ;;  %v2087_v49 = vld [vmem:[%s4534_s2 + $0x128] sm:$0xff]  ;;  %v2092_v50 = vld [vmem:[%s4534_s2 + $0x150] sm:$0xff] }
 0x52a   :  { %1897 = vmatprep.subr.mxu0 %v4777_v7  ;;  %1968 = vmatprep.subr.mxu1 %v4778_v9  ;;  %v2086_v7 = vld [vmem:[%s4534_s2 + $0x120] sm:$0xff]  ;;  %v2089_v9 = vld [vmem:[%s4534_s2 + $0x138] sm:$0xff] }
 0x52b   :  { %1898 = vmatpush1.msra.mxu0 %v4779_v10  ;;  %1969 = vmatpush1.msra.mxu1 %v4780_v11  ;;  %v2083_v10 = vld [vmem:[%s4534_s2 + $0x108] sm:$0xff]  ;;  %v2088_v11 = vld [vmem:[%s4534_s2 + $0x130] sm:$0xff] }
 0x52c   :  { %1899 = vmatprep.subr.mxu0 %v4781_v12  ;;  %1970 = vmatprep.subr.mxu1 %v4782_v14  ;;  %v2082_v12 = vld [vmem:[%s4534_s2 + $0x100] sm:$0xff]  ;;  %v2085_v14 = vld [vmem:[%s4534_s2 + $0x118] sm:$0xff] }
 0x52d   :  { %1900 = vmatpush1.msra.mxu0 %v4783_v15  ;;  %1971 = vmatpush1.msra.mxu1 %v4784_v16  ;;  %v2079_v15 = vld [vmem:[%s4534_s2 + $0xe8] sm:$0xff]  ;;  %v2084_v16 = vld [vmem:[%s4534_s2 + $0x110] sm:$0xff] }
 0x52e   :  { %1901 = vmatprep.subr.mxu0 %v4785_v17  ;;  %1972 = vmatprep.subr.mxu1 %v4786_v19  ;;  %v2078_v17 = vld [vmem:[%s4534_s2 + $0xe0] sm:$0xff]  ;;  %v2081_v19 = vld [vmem:[%s4534_s2 + $0xf8] sm:$0xff] }
 0x52f   :  { %1902 = vmatpush1.msra.mxu0 %v4787_v21  ;;  %1935 = vmatprep.mubr.f32.mxu0 %v4788_v23  ;;  %v2075_v21 = vld [vmem:[%s4534_s2 + $0xc8] sm:$0xff] }
 0x530   :  { %1973 = vmatpush1.msra.mxu1 %v4789_v24  ;;  %2006 = vmatprep.mubr.f32.mxu1 %v4788_v23  ;;  %v2074_v24 = vld [vmem:[%s4534_s2 + $0xc0] sm:$0xff] }
 0x531   :  { %2185 = vmatprep.subr.mxu1 %v4790_v26  ;;  %2114 = vmatprep.subr.mxu0 %v2111_v31  ;;  %v2077_v26 = vld [vmem:[%s4534_s2 + $0xd8] sm:$0xff] }
 0x5d0   :  { %v1694_v27 = vpop.f32.mrf.mxu0  ;;  %v1765_v57 = vpop.f32.mrf.mxu1 }
 0x5d1   :  { %v1770_v29 = vadd.f32 %v1694_v27, %v4791_v28  ;;  %v1772_v59 = vadd.f32 %v1765_v57, %v4793_v58  ;;  %v2071_v27 = vld [vmem:[%s4534_s2 + $0xa8] sm:$0xff]  ;;  %v2076_v28 = vld [vmem:[%s4534_s2 + $0xd0] sm:$0xff] }
 0x5d2   :  { %v1696_v33 = vpop.f32.mrf.mxu0  ;;  %v1767_v61 = vpop.f32.mrf.mxu1  ;;  %v2063_v57 = vld [vmem:[%s4534_s2 + $0x68] sm:$0xff]  ;;  %v2068_v58 = vld [vmem:[%s4534_s2 + $0x90] sm:$0xff] }
 0x5d3   :  { %v2549_v52 = vmul.f32 -1.442695, %v1770_v29  ;;  %v1771_v55 = vadd.f32 %v1696_v33, %v4792_v53  ;;  %v2551_v63 = vmul.f32 -1.442695, %v1772_v59  ;;  %v1773_v8 = vadd.f32 %v1767_v61, %v4794_v1  ;;  %v2070_v29 = vld [vmem:[%s4534_s2 + $0xa0] sm:$0xff]  ;;  %v2073_v33 = vld [vmem:[%s4534_s2 + $0xb8] sm:$0xff] }
 0x5d4   :  { %v2072_v53 = vld [vmem:[%s4534_s2 + $0xb0] sm:$0xff]  ;;  %v2062_v59 = vld [vmem:[%s4534_s2 + $0x60] sm:$0xff]  ;;  %v2065_v61 = vld [vmem:[%s4534_s2 + $0x78] sm:$0xff] }
 0x5d5   :  { %2716 = vpow2.f32 %v2549_v52  ;;  %v2550_v56 = vmul.f32 -1.442695, %v1771_v55  ;;  %v2067_v52 = vld [vmem:[%s4534_s2 + $0x88] sm:$0xff]  ;;  %v2066_v55 = vld [vmem:[%s4534_s2 + $0x80] sm:$0xff]  ;;  %v2064_v1 = vld [vmem:[%s4534_s2 + $0x70] sm:$0xff] }
 0x5d7   :  { %2718 = vpow2.f32 %v2550_v56  ;;  %v2069_v56 = vld [vmem:[%s4534_s2 + $0x98] sm:$0xff] }
 0x5d8   :  { %2720 = vpow2.f32 %v2551_v63  ;;  %v2059_v63 = vld [vmem:[%s4534_s2 + $0x48] sm:$0xff] }
 0x5d9   :  { %2722 = vtanh.f32 %v1773_v8  ;;  %v2058_v8 = vld [vmem:[%s4534_s2 + $0x40] sm:$0xff] }
 0x5e2   :  { %v2717_v34 = vpop.eup %2716 }
 0x5e3   :  { %v1783_v5 = vadd.f32 1.0, %v2717_v34  ;;  %v2061_v34 = vld [vmem:[%s4534_s2 + $0x58] sm:$0xff] }
 0x5e4   :  { %v2719_v42 = vpop.eup %2718 }
 0x5e5   :  { %2724 = vrcp.f32 %v1783_v5  ;;  %v1784_v40 = vadd.f32 1.0, %v2719_v42  ;;  %v2721_v2 = vpop.eup %2720  ;;  %v2055_v5 = vld [vmem:[%s4534_s2 + $0x28] sm:$0xff]  ;;  %v2060_v42 = vld [vmem:[%s4534_s2 + $0x50] sm:$0xff] }
 0x5e6   :  { %v2723_v6 = vpop.eup %2722  ;;  %v1785_v25 = vadd.f32 1.0, %v2721_v2  ;;  %v2057_v2 = vld [vmem:[%s4534_s2 + $0x38] sm:$0xff] }
 0x5e7   :  { %2726 = vrcp.f32 %v1784_v40  ;;  %v2054_v40 = vld [vmem:[%s4534_s2 + $0x20] sm:$0xff] }
 0x5e8   :  { %2728 = vrcp.f32 %v1785_v25  ;;  %v2052_v25 = vld [vmem:[%s4534_s2 + $0x10] sm:$0xff] }
 0x5f2   :  { %v2725_v54 = vpop.eup %2724 }
 0x5f3   :  { %v1794_v36 = vmul.f32 %v2725_v54, %v2723_v6  ;;  %v2051_v6 = vld [vmem:[%s4534_s2 + $0x8] sm:$0xff]  ;;  %v2056_v54 = vld [vmem:[%s4534_s2 + $0x30] sm:$0xff] }
 0x5f4   :  { %v2727_v43 = vpop.eup %2726 }
 0x5f5   :  { %v1793_v51 = vmul.f32 %v2727_v43, %v4147_v13  ;;  %v2729_v18 = vpop.eup %2728  ;;  %v2094_v13 = vld [vmem:[%s4534_s2 + $0x160] sm:$0xff]  ;;  %v2053_v43 = vld [vmem:[%s4534_s2 + $0x18] sm:$0xff] }
 0x5f7   :  { %v4224_v41 = vadd.f32 %v1794_v36, %v1793_v51  ;;  %v2050_v36 = vld [vmem:[%s4534_s2] sm:$0xff]  ;;  %v2311_v51 = vld [vmem:[%s4536_s4 + $0x78] sm:$0xff] }
 0x5f9   :  { %2730 = vtanh.f32 %v4224_v41 }
 0x606   :  { %v2731_v20 = vpop.eup %2730 }
 0x607   :  { %v4227_v44 = vmul.f32 %v2731_v20, %v2729_v18  ;;  %v4795_v20 = vld [vmem:[#allocation50_spill] sm:$0xff] }
 0x609   :  { %1936 = vmatmul.mubr.f32.vlgmr.msra.gmra.mxu0 %v4227_v44  ;;  %2007 = vmatmul.mubr.f32.vlgmr.msra.gmra.mxu1 %v4227_v44 }
 0x60a   :  { %2186 = vmatpush1.msra.mxu1 %v4010_v60  ;;  %2178 = vmatprep.mubr.f32.mxu0 %v4788_v23  ;;  %v2110_v60 = vld [vmem:[%s4534_s2 + $0x1e0] sm:$0xff] }
 0x60b   :  { %2187 = vmatprep.subr.mxu1 %v4016_v62  ;;  %2249 = vmatprep.mubr.f32.mxu1 %v4788_v23  ;;  %v2107_v62 = vld [vmem:[%s4534_s2 + $0x1c8] sm:$0xff]  ;;  %v2080_v23 = vld [vmem:[%s4534_s2 + $0xf0] sm:$0xff] }
 0x60c   :  { %2188 = vmatpush1.msra.mxu1 %v4022_v0  ;;  %2115 = vmatpush1.msra.mxu0 %v2110_v60  ;;  %v2106_v0 = vld [vmem:[%s4534_s2 + $0x1c0] sm:$0xff] }
 0x60d   :  { %2189 = vmatprep.subr.mxu1 %v4028_v35  ;;  %2116 = vmatprep.subr.mxu0 %v2107_v62  ;;  %v2103_v35 = vld [vmem:[%s4534_s2 + $0x1a8] sm:$0xff] }
 0x60e   :  { %2190 = vmatpush1.msra.mxu1 %v4034_v39  ;;  %2117 = vmatpush1.msra.mxu0 %v2106_v0  ;;  %v2102_v39 = vld [vmem:[%s4534_s2 + $0x1a0] sm:$0xff]  ;;  %v4796_v0 = vld [vmem:[#allocation51_spill] sm:$0xff] }
 0x60f   :  { %2118 = vmatprep.subr.mxu0 %v2103_v35  ;;  %2191 = vmatprep.subr.mxu1 %v2101_v32 }
 0x610   :  { %2119 = vmatpush1.msra.mxu0 %v2102_v39  ;;  %2192 = vmatpush1.msra.mxu1 %v2100_v45 }
 0x611   :  { %2120 = vmatprep.subr.mxu0 %v2099_v3  ;;  %2193 = vmatprep.subr.mxu1 %v2097_v37 }
 0x612   :  { %2121 = vmatpush1.msra.mxu0 %v2098_v22  ;;  %2194 = vmatpush1.msra.mxu1 %v2096_v46  ;;  %v4797_v22 = vld [vmem:[#allocation36_spill] sm:$0xff] }
 0x613   :  { %2122 = vmatprep.subr.mxu0 %v2095_v38  ;;  %2195 = vmatprep.subr.mxu1 %v2093_v48 }
 0x614   :  { %2123 = vmatpush1.msra.mxu0 %v2094_v13  ;;  %2196 = vmatpush1.msra.mxu1 %v2092_v50  ;;  %v4798_v13 = vld [vmem:[#allocation37_spill] sm:$0xff] }
 0x615   :  { %2124 = vmatprep.subr.mxu0 %v2091_v4  ;;  %2197 = vmatprep.subr.mxu1 %v2089_v9 }
 0x616   :  { %2125 = vmatpush1.msra.mxu0 %v2090_v47  ;;  %2198 = vmatpush1.msra.mxu1 %v2088_v11 }
 0x617   :  { %2126 = vmatprep.subr.mxu0 %v2087_v49  ;;  %2199 = vmatprep.subr.mxu1 %v2085_v14 }
 0x618   :  { %2127 = vmatpush1.msra.mxu0 %v2086_v7  ;;  %2200 = vmatpush1.msra.mxu1 %v2084_v16 }
 0x619   :  { %2128 = vmatprep.subr.mxu0 %v2083_v10  ;;  %2201 = vmatprep.subr.mxu1 %v2081_v19  ;;  %v2310_v19 = vld [vmem:[%s4536_s4 + $0x70] sm:$0xff] }
 0x61a   :  { %2129 = vmatpush1.msra.mxu0 %v2082_v12  ;;  %2202 = vmatpush1.msra.mxu1 %v2080_v23  ;;  %v2308_v23 = vld [vmem:[%s4536_s4 + $0x60] sm:$0xff] }
 0x61b   :  { %2130 = vmatprep.subr.mxu0 %v2079_v15  ;;  %2203 = vmatprep.subr.mxu1 %v2077_v26  ;;  %v2306_v26 = vld [vmem:[%s4536_s4 + $0x50] sm:$0xff] }
 0x61c   :  { %2131 = vmatpush1.msra.mxu0 %v2078_v17  ;;  %2204 = vmatpush1.msra.mxu1 %v2076_v28  ;;  %v2304_v28 = vld [vmem:[%s4536_s4 + $0x40] sm:$0xff] }
 0x61d   :  { %2132 = vmatprep.subr.mxu0 %v2075_v21  ;;  %2205 = vmatprep.subr.mxu1 %v2073_v33  ;;  %v4799_v21 = vld [vmem:[#allocation53_spill] sm:$0xff]  ;;  %v2302_v33 = vld [vmem:[%s4536_s4 + $0x30] sm:$0xff] }
 0x61e   :  { %2133 = vmatpush1.msra.mxu0 %v2074_v24  ;;  %2206 = vmatpush1.msra.mxu1 %v2072_v53  ;;  %v2307_v24 = vld [vmem:[%s4536_s4 + $0x58] sm:$0xff]  ;;  %v2300_v53 = vld [vmem:[%s4536_s4 + $0x20] sm:$0xff] }
 0x61f   :  { %2134 = vmatprep.subr.mxu0 %v2071_v27  ;;  %2207 = vmatprep.subr.mxu1 %v2069_v56  ;;  %v2305_v27 = vld [vmem:[%s4536_s4 + $0x48] sm:$0xff]  ;;  %v2298_v56 = vld [vmem:[%s4536_s4 + $0x10] sm:$0xff] }
 0x620   :  { %2135 = vmatpush1.msra.mxu0 %v2070_v29  ;;  %2208 = vmatpush1.msra.mxu1 %v2068_v58  ;;  %v2303_v29 = vld [vmem:[%s4536_s4 + $0x38] sm:$0xff]  ;;  %v2296_v58 = vld [vmem:[%s4536_s4] sm:$0xff] }
 0x621   :  { %2136 = vmatprep.subr.mxu0 %v2067_v52  ;;  %2209 = vmatprep.subr.mxu1 %v2065_v61  ;;  %v2301_v52 = vld [vmem:[%s4536_s4 + $0x28] sm:$0xff]  ;;  %v4801_v61 = vld [vmem:[#allocation27_spill] sm:$0xff] }
 0x622   :  { %2137 = vmatpush1.msra.mxu0 %v2066_v55  ;;  %2210 = vmatpush1.msra.mxu1 %v2064_v1  ;;  %v2299_v55 = vld [vmem:[%s4536_s4 + $0x18] sm:$0xff] }
 0x623   :  { %2138 = vmatprep.subr.mxu0 %v2063_v57  ;;  %2211 = vmatprep.subr.mxu1 %v2061_v34  ;;  %v2297_v57 = vld [vmem:[%s4536_s4 + $0x8] sm:$0xff]  ;;  %v4804_v34 = vld [vmem:[#allocation4_spill] sm:$0xff] }
 0x624   :  { %2139 = vmatpush1.msra.mxu0 %v2062_v59  ;;  %2212 = vmatpush1.msra.mxu1 %v2060_v42  ;;  %v4800_v59 = vld [vmem:[#allocation5_spill] sm:$0xff]  ;;  %v4805_v42 = vld [vmem:[#allocation52_spill] sm:$0xff] }
 0x625   :  { %2140 = vmatprep.subr.mxu0 %v2059_v63  ;;  %2213 = vmatprep.subr.mxu1 %v2057_v2  ;;  %v4802_v63 = vld [vmem:[#allocation28_spill] sm:$0xff] }
 0x626   :  { %2141 = vmatpush1.msra.mxu0 %v2058_v8  ;;  %2214 = vmatpush1.msra.mxu1 %v2056_v54  ;;  %v4803_v8 = vld [vmem:[#allocation42_spill] sm:$0xff] }
 0x627   :  { %2142 = vmatprep.subr.mxu0 %v2055_v5  ;;  %2215 = vmatprep.subr.mxu1 %v2053_v43  ;;  %v196_v5 = vadd.f32 %v4804_v34, %v4803_v8 }
 0x628   :  { %2143 = vmatpush1.msra.mxu0 %v2054_v40  ;;  %2216 = vmatpush1.msra.mxu1 %v2052_v25 }
 0x629   :  { %2144 = vmatprep.subr.mxu0 %v2051_v6 }
 0x62a   :  { %2145 = vmatpush1.msra.mxu0 %v2050_v36 }
 0x62b   :  { %2591 = vmatprep.subr.mxu0 %v2311_v51 }
 0x6c9   :  { %v1937_v18 = vpop.f32.mrf.mxu0  ;;  %v2008_v3 = vpop.f32.mrf.mxu1 }
 0x6ca   :  { %v2013_v31 = vadd.f32 %v1937_v18, %v4795_v20  ;;  %v2015_v32 = vadd.f32 %v2008_v3, %v4797_v22  ;;  %v4807_v20 = vld [vmem:[#allocation39_spill] sm:$0xff] }
 0x6cb   :  { %v1939_v60 = vpop.f32.mrf.mxu0  ;;  %v2010_v38 = vpop.f32.mrf.mxu1 }
 0x6cc   :  { %v2552_v62 = vmul.f32 -1.442695, %v2013_v31  ;;  %v2014_v35 = vadd.f32 %v1939_v60, %v4796_v0  ;;  %v2554_v45 = vmul.f32 -1.442695, %v2015_v32  ;;  %v2016_v37 = vadd.f32 %v2010_v38, %v4798_v13 }
 0x6ce   :  { %2732 = vpow2.f32 %v2552_v62  ;;  %v2553_v39 = vmul.f32 -1.442695, %v2014_v35  ;;  %v4482_v35 = vld [vmem:[%s4537_s5] ss:$0 sm:$0xff] }
 0x6d0   :  { %2734 = vpow2.f32 %v2553_v39 }
 0x6d1   :  { %2736 = vpow2.f32 %v2554_v45 }
 0x6d2   :  { %2738 = vtanh.f32 %v2016_v37 }
 0x6db   :  { %v2733_v4 = vpop.eup %2732 }
 0x6dc   :  { %v2026_v46 = vadd.f32 1.0, %v2733_v4 }
 0x6dd   :  { %v2735_v47 = vpop.eup %2734 }
 0x6de   :  { %2740 = vrcp.f32 %v2026_v46  ;;  %v2027_v48 = vadd.f32 1.0, %v2735_v47  ;;  %v2737_v49 = vpop.eup %2736 }
 0x6df   :  { %v2739_v50 = vpop.eup %2738  ;;  %v2028_v11 = vadd.f32 1.0, %v2737_v49 }
 0x6e0   :  { %2742 = vrcp.f32 %v2027_v48 }
 0x6e1   :  { %2744 = vrcp.f32 %v2028_v11 }
 0x6eb   :  { %v2741_v7 = vpop.eup %2740 }
 0x6ec   :  { %v2037_v9 = vmul.f32 %v2741_v7, %v2739_v50 }
 0x6ed   :  { %v2743_v10 = vpop.eup %2742 }
 0x6ee   :  { %v2036_v12 = vmul.f32 %v2743_v10, %v4224_v41  ;;  %v2745_v15 = vpop.eup %2744  ;;  %v2309_v41 = vld [vmem:[%s4536_s4 + $0x68] sm:$0xff] }
 0x6f0   :  { %v4420_v14 = vadd.f32 %v2037_v9, %v2036_v12 }
 0x6f2   :  { %2746 = vtanh.f32 %v4420_v14 }
 0x6ff   :  { %v2747_v16 = vpop.eup %2746 }
 0x700   :  { %v2040_v17 = vmul.f32 %v2747_v16, %v2745_v15 }
 0x702   :  { %2179 = vmatmul.mubr.f32.vlgmr.msra.gmra.mxu0 %v2040_v17  ;;  %2250 = vmatmul.mubr.f32.vlgmr.msra.gmra.mxu1 %v2040_v17 }
 0x703   :  { %2592 = vmatpush3.msra.mxu0 %v2311_v51  ;;  %2623 = vmatprep.mubr.f32.mxu0 %v4799_v21  ;;  %v4806_v51 = vld [vmem:[#allocation40_spill] sm:$0xff] }
 0x704   :  { %2593 = vmatprep.subr.mxu0 %v2310_v19 }
 0x705   :  { %2594 = vmatpush3.msra.mxu0 %v2310_v19 }
 0x706   :  { %2595 = vmatprep.subr.mxu0 %v2309_v41 }
 0x707   :  { %2596 = vmatpush3.msra.mxu0 %v2309_v41 }
 0x708   :  { %2597 = vmatprep.subr.mxu0 %v2308_v23 }
 0x709   :  { %2598 = vmatpush3.msra.mxu0 %v2308_v23 }
 0x70a   :  { %2599 = vmatprep.subr.mxu0 %v2307_v24 }
 0x70b   :  { %2600 = vmatpush3.msra.mxu0 %v2307_v24 }
 0x70c   :  { %2601 = vmatprep.subr.mxu0 %v2306_v26 }
 0x70d   :  { %2602 = vmatpush3.msra.mxu0 %v2306_v26 }
 0x70e   :  { %2603 = vmatprep.subr.mxu0 %v2305_v27 }
 0x70f   :  { %2604 = vmatpush3.msra.mxu0 %v2305_v27 }
 0x710   :  { %2605 = vmatprep.subr.mxu0 %v2304_v28 }
 0x711   :  { %2606 = vmatpush3.msra.mxu0 %v2304_v28 }
 0x712   :  { %2607 = vmatprep.subr.mxu0 %v2303_v29 }
 0x713   :  { %2608 = vmatpush3.msra.mxu0 %v2303_v29 }
 0x714   :  { %2609 = vmatprep.subr.mxu0 %v2302_v33 }
 0x715   :  { %2610 = vmatpush3.msra.mxu0 %v2302_v33 }
 0x716   :  { %2611 = vmatprep.subr.mxu0 %v2301_v52 }
 0x717   :  { %2612 = vmatpush3.msra.mxu0 %v2301_v52 }
 0x718   :  { %2613 = vmatprep.subr.mxu0 %v2300_v53 }
 0x719   :  { %2614 = vmatpush3.msra.mxu0 %v2300_v53 }
 0x71a   :  { %2615 = vmatprep.subr.mxu0 %v2299_v55 }
 0x71b   :  { %2616 = vmatpush3.msra.mxu0 %v2299_v55 }
 0x71c   :  { %2617 = vmatprep.subr.mxu0 %v2298_v56 }
 0x71d   :  { %2618 = vmatpush3.msra.mxu0 %v2298_v56 }
 0x71e   :  { %2619 = vmatprep.subr.mxu0 %v2297_v57 }
 0x71f   :  { %2620 = vmatpush3.msra.mxu0 %v2297_v57 }
 0x720   :  { %2621 = vmatprep.subr.mxu0 %v2296_v58 }
 0x721   :  { %2622 = vmatpush3.msra.mxu0 %v2296_v58  ;;  %v4808_v58 = vlaneseq }
 0x722   :  { %2624 = vmatmul.mubr.f32.vlgmr.msra.gmra.mxu0 %v4800_v59 }
 0x723   :  { %2626 = vmatprep.mubr.f32.mxu0 %v4801_v61  ;;  %v2425_v59 = vand.u32 127, %v4808_v58 }
 0x725   :  { %vm2426_vm1 = vcmp.eq.s32.totalorder %v2425_v59, 0 }
 0x726   :  { %2627 = vmatmul.mubr.f32.gmra.mxu0 %v4802_v63 }
 0x727   :  { %2629 = vmatprep.mubr.f32.mxu0 %v4150_v30 }
 0x72a   :  { %2630 = vmatmul.mubr.f32.gmra.mxu0 %v4227_v44 }
 0x72b   :  { %2632 = vmatprep.mubr.f32.mxu0 %v2040_v17 }
 0x7c2   :  { %v2180_v1 = vpop.f32.mrf.mxu0  ;;  %v2251_v43 = vpop.f32.mrf.mxu1 }
 0x7c3   :  { %v2256_v40 = vadd.f32 %v2180_v1, %v4805_v42  ;;  %v2258_v44 = vadd.f32 %v2251_v43, %v4807_v20 }
 0x7c4   :  { %v2182_v2 = vpop.f32.mrf.mxu0  ;;  %v2253_v25 = vpop.f32.mrf.mxu1 }
 0x7c5   :  { %v2555_v6 = vmul.f32 -1.442695, %v2256_v40  ;;  %v2257_v54 = vadd.f32 %v2182_v2, %v196_v5  ;;  %v2259_v18 = vadd.f32 %v2253_v25, %v4806_v51  ;;  %v2557_v0 = vmul.f32 -1.442695, %v2258_v44 }
 0x7c7   :  { %2748 = vpow2.f32 %v2555_v6  ;;  %v2556_v36 = vmul.f32 -1.442695, %v2257_v54 }
 0x7c9   :  { %2750 = vpow2.f32 %v2556_v36 }
 0x7ca   :  { %2752 = vtanh.f32 %v2259_v18 }
 0x7d4   :  { %v2749_v30 = vpop.eup %2748 }
 0x7d5   :  { %v2269_v31 = vadd.f32 1.0, %v2749_v30 }
 0x7d6   :  { %v2751_v60 = vpop.eup %2750 }
 0x7d7   :  { %2754 = vrcp.f32 %v2269_v31  ;;  %v2270_v62 = vadd.f32 1.0, %v2751_v60  ;;  %v2753_v3 = vpop.eup %2752 }
 0x7d9   :  { %2756 = vrcp.f32 %v2270_v62 }
 0x7da   :  { %2758 = vpow2.f32 %v2557_v0 }
 0x7e2   :  { %v2625_v39 = vpop.f32.mrf.mxu0 }
 0x7e3   :  { %v2391_v22 = vadd.f32 %v2625_v39, %v4482_v35 }
 0x7e4   :  { %v2755_v32 = vpop.eup %2754  ;;  %v2385_v38 = vpop.f32.mrf.mxu0 }
 0x7e5   :  { %v2280_v45 = vmul.f32 %v2755_v32, %v2753_v3  ;;  %v2560_v13 = vmul.f32 -1.442695, %v2391_v22  ;;  %v2386_v37 = vadd.f32 %v4482_v35, %v2385_v38 }
 0x7e6   :  { %v2757_v4 = vpop.eup %2756  ;;  %v2628_v46 = vpop.f32.mrf.mxu0 }
 0x7e7   :  { %v2279_v47 = vmul.f32 %v2757_v4, %v4420_v14  ;;  %2760 = vpow2.f32 %v2560_v13  ;;  %v2559_v48 = vmul.f32 -1.442695, %v2386_v37  ;;  %v2401_v49 = vadd.f32 %v2628_v46, %v4482_v35  ;;  %v2759_v7 = vpop.eup %2758 }
 0x7e8   :  { %v2395_v50 = vpop.f32.mrf.mxu0  ;;  %v2271_v16 = vadd.f32 1.0, %v2759_v7 }
 0x7e9   :  { %v2281_v9 = vadd.f32 %v2280_v45, %v2279_v47  ;;  %2762 = vpow2.f32 %v2559_v48  ;;  %v2562_v10 = vmul.f32 -1.442695, %v2401_v49  ;;  %v2396_v11 = vadd.f32 %v4482_v35, %v2395_v50 }
 0x7ea   :  { %v2631_v12 = vpop.f32.mrf.mxu0 }
 0x7eb   :  { %2287 = vst [vmem:[%s4538_s8] sm:$0xff] %v2281_v9  ;;  %2764 = vpow2.f32 %v2562_v10  ;;  %v2561_v15 = vmul.f32 -1.442695, %v2396_v11  ;;  %v2411_v14 = vadd.f32 %v2631_v12, %v4482_v35 }
 0x7ec   :  { %v2405_v17 = vpop.f32.mrf.mxu0 }
 0x7ed   :  { %2766 = vpow2.f32 %v2561_v15  ;;  %v2564_v19 = vmul.f32 -1.442695, %v2411_v14  ;;  %v2406_v21 = vadd.f32 %v4482_v35, %v2405_v17 }
 0x7ef   :  { %2768 = vpow2.f32 %v2564_v19  ;;  %v2563_v41 = vmul.f32 -1.442695, %v2406_v21 }
 0x7f0   :  { %2770 = vrcp.f32 %v2271_v16 }
 0x7f1   :  { %2772 = vpow2.f32 %v2563_v41 }
 0x7f2   :  { %2774 = vtanh.f32 %v2281_v9 }
 0x7f3   :  { %2776 = vtanh.f32 %v2391_v22 }
 0x7f4   :  { %v2761_v23 = vpop.eup %2760 }
 0x7f5   :  { %v2460_v24 = vadd.f32 1.0, %v2761_v23 }
 0x7f6   :  { %v2763_v26 = vpop.eup %2762 }
 0x7f7   :  { %2778 = vrcp.f32 %v2460_v24  ;;  %v2459_v27 = vadd.f32 1.0, %v2763_v26 }
 0x7f8   :  { %v2765_v28 = vpop.eup %2764  ;;  %2780 = vtanh.f32 %v2386_v37 }
 0x7f9   :  { %2782 = vrcp.f32 %v2459_v27  ;;  %v2462_v29 = vadd.f32 1.0, %v2765_v28 }
 0x7fa   :  { %v2767_v33 = vpop.eup %2766  ;;  %2784 = vtanh.f32 %v2401_v49 }
 0x7fb   :  { %2786 = vrcp.f32 %v2462_v29  ;;  %v2461_v52 = vadd.f32 1.0, %v2767_v33 }
 0x7fc   :  { %v2769_v53 = vpop.eup %2768  ;;  %2788 = vtanh.f32 %v2396_v11 }
 0x7fd   :  { %v2771_v55 = vpop.eup %2770  ;;  %2790 = vrcp.f32 %v2461_v52  ;;  %v2464_v56 = vadd.f32 1.0, %v2769_v53 }
 0x7fe   :  { %v2773_v57 = vpop.eup %2772  ;;  %2792 = vtanh.f32 %v2411_v14 }
 0x7ff   :  { %v2775_v61 = vpop.eup %2774  ;;  %2794 = vrcp.f32 %v2464_v56  ;;  %v2463_v63 = vadd.f32 1.0, %v2773_v57 }
 0x800   :  { %2796 = vtanh.f32 %v2406_v21  ;;  %v2283_v1 = vmul.f32 %v2775_v61, %v2771_v55  ;;  %v2777_v8 = vpop.eup %2776 }
 0x801   :  { %2798 = vrcp.f32 %v2463_v63 }
 0x802   :  { %2286 = vst [vmem:[%s4539_s7] sm:$0xff] %v2283_v1  ;;  %2633 = vmatmul.mubr.f32.gmra.mxu0 %v2283_v1 }
 0x804   :  { %v2779_v34 = vpop.eup %2778 }
 0x805   :  { %v2781_v5 = vpop.eup %2780  ;;  %v2484_v42 = vsel %vm2426_vm1, %v2777_v8, %v2779_v34 }
 0x806   :  { %v2783_v40 = vpop.eup %2782  ;;  %2492 = vst [vmem:[%s4540_s6 + $0x8] sm:$0xff] %v2484_v42 }
 0x807   :  { %v2785_v2 = vpop.eup %2784  ;;  %v2483_v6 = vsel %vm2426_vm1, %v2781_v5, %v2783_v40 }
 0x808   :  { %v2787_v54 = vpop.eup %2786  ;;  %2491 = vst [vmem:[%s4540_s6] sm:$0xff] %v2483_v6 }
 0x809   :  { %v2789_v36 = vpop.eup %2788  ;;  %v2486_v43 = vsel %vm2426_vm1, %v2785_v2, %v2787_v54 }
 0x80a   :  { %v2791_v25 = vpop.eup %2790  ;;  %2494 = vst [vmem:[%s4540_s6 + $0x18] sm:$0xff] %v2486_v43 }
 0x80b   :  { %v2793_v51 = vpop.eup %2792  ;;  %v2485_v18 = vsel %vm2426_vm1, %v2789_v36, %v2791_v25 }
 0x80c   :  { %v2795_v30 = vpop.eup %2794  ;;  %2493 = vst [vmem:[%s4540_s6 + $0x10] sm:$0xff] %v2485_v18 }
 0x80d   :  { %v2797_v20 = vpop.eup %2796  ;;  %v2488_v44 = vsel %vm2426_vm1, %v2793_v51, %v2795_v30 }
 0x80e   :  { %v2799_v31 = vpop.eup %2798  ;;  %2496 = vst [vmem:[%s4540_s6 + $0x28] sm:$0xff] %v2488_v44 }
 0x80f   :  { %v2487_v60 = vsel %vm2426_vm1, %v2797_v20, %v2799_v31 }
 0x810   :  { %2495 = vst [vmem:[%s4540_s6 + $0x20] sm:$0xff] %v2487_v60 }
 0x8c2   :  { %v2634_v62 = vpop.f32.mrf.mxu0 }
 0x8c3   :  { %v2421_v0 = vadd.f32 %v2634_v62, %v4482_v35 }
 0x8c4   :  { %v2415_v39 = vpop.f32.mrf.mxu0 }
 0x8c5   :  { %v2566_v3 = vmul.f32 -1.442695, %v2421_v0  ;;  %v2416_v22 = vadd.f32 %v4482_v35, %v2415_v39 }
 0x8c7   :  { %2800 = vpow2.f32 %v2566_v3  ;;  %v2565_v32 = vmul.f32 -1.442695, %v2416_v22 }
 0x8c9   :  { %2802 = vpow2.f32 %v2565_v32 }
 0x8ca   :  { %2804 = vtanh.f32 %v2421_v0 }
 0x8d4   :  { %v2801_v38 = vpop.eup %2800 }
 0x8d5   :  { %v2466_v45 = vadd.f32 1.0, %v2801_v38 }
 0x8d6   :  { %v2803_v13 = vpop.eup %2802 }
 0x8d7   :  { %2806 = vrcp.f32 %v2466_v45  ;;  %v2465_v37 = vadd.f32 1.0, %v2803_v13  ;;  %v2805_v4 = vpop.eup %2804 }
 0x8d8   :  { %2808 = vtanh.f32 %v2416_v22 }
 0x8d9   :  { %2810 = vrcp.f32 %v2465_v37 }
 0x8e4   :  { %v2807_v46 = vpop.eup %2806 }
 0x8e5   :  { %v2809_v47 = vpop.eup %2808  ;;  %v2490_v48 = vsel %vm2426_vm1, %v2805_v4, %v2807_v46 }
 0x8e6   :  { %v2811_v49 = vpop.eup %2810  ;;  %2498 = vst [vmem:[%s4540_s6 + $0x38] sm:$0xff] %v2490_v48 }
 0x8e7   :  { %v2489_v35 = vsel %vm2426_vm1, %v2809_v47, %v2811_v49 }
 0x8e8   :  { %2497 = vst [vmem:[%s4540_s6 + $0x30] sm:$0xff] %v2489_v35 }

</bundles_post_ra>
